<compile_context>
chip_gen: v6e
topology: v6e:2x2x1
jax: 0.10.0
libtpu: 0.0.40
codegen_flags: <defaults>
</compile_context>

<pallas_src>
import numpy as np
import jax
import jax.numpy as jnp
from jax import lax
from jax.experimental import pallas as pl
from jax.experimental.pallas import tpu as pltpu

NEG_SLOPE = 0.2


def _round_up(n, m):
    return ((n + m - 1) // m) * m


def _leaky(v):
    return jnp.where(v >= 0, v, NEG_SLOPE * v)


def _choose_batch_tile(B, cap=8):
    """Largest divisor of B (<= cap) that still leaves >= 2 grid steps (keeps both v7x TCs busy)."""
    if B < 2:
        return 1
    best = 1
    for bt in range(1, min(cap, B // 2) + 1):
        if B % bt == 0:
            best = bt
    return best


def _derive_vmem_limit(Bt, Cin_p, Cout_p, Np):
    """Per-step VMEM footprint, x2 for the double-buffered pipeline, +25% headroom.
    Capped at 48 MiB = 75% of v7x's 64 MiB physical VMEM (v5e/v6e have 128 MiB and never hit it)."""
    bf16, f32 = 2, 4
    K1, K2 = 9 * Cin_p, 9 * Cout_p
    streams = (Bt * K1 * Np * bf16                 # pre-gathered conv1 operand block
               + Bt * Cin_p * Np * f32             # raw x block (residual path)
               + Bt * Cout_p * Np * f32            # output block
               + 9 * Np * Np * bf16                # sel (constant block, still buffered)
               + (Cout_p * K1 + Cout_p * K2) * bf16
               + Cout_p * Cin_p * f32 + 3 * Cout_p * f32)
    temps = (Bt * K1 * Np * bf16                   # g1 lane-concat
             + 2 * Bt * K2 * Np * f32              # conv2 gather results + stacked G2
             + 6 * Bt * Cout_p * Np * f32)         # y1 / a2 / y2 / res / out + slack
    need = int((2 * streams + temps) * 1.25) + (4 << 20)
    return max(16 << 20, min(need, 48 << 20))


# ----------------------------- fused Pallas kernel -----------------------------

def _residual_block_kernel(xg_ref, x_ref, sel_ref, w1_ref, b1_ref, w2_ref, b2_ref,
                           wr_ref, br_ref, o_ref):
    # xg_ref : (Bt, 9*Cin_p, Np) bf16  pre-gathered LeakyReLU(x) (conv1 operand, K laid out k-major)
    # x_ref  : (Bt, Cin_p,  Np) f32    raw x (residual 1x1 conv)
    # sel_ref: (9, Np, Np)      bf16   one-hot neighbour-selection matrices (conv2's gather)
    # w1_ref : (Cout_p, 9*Cin_p)  bf16   b1_ref: (Cout_p, 1) f32
    # w2_ref : (Cout_p, 9*Cout_p) bf16   b2_ref: (Cout_p, 1) f32
    # wr_ref : (Cout_p, Cin_p)    f32    br_ref: (Cout_p, 1) f32
    # o_ref  : (Bt, Cout_p, Np)   f32
    Bt = xg_ref.shape[0]
    Np = xg_ref.shape[-1]

    # ---- conv1: single K = 9*Cin_p dot, N = Bt*Np (batch elements concatenated along lanes) ----
    g1 = jnp.concatenate([xg_ref[i] for i in range(Bt)], axis=-1)          # (9*Cin_p, Bt*Np) bf16
    y1 = jnp.dot(w1_ref[...], g1, preferred_element_type=jnp.float32) + b1_ref[...]

    # ---- LeakyReLU (f32) then conv2 ----
    a2 = _leaky(y1).astype(jnp.bfloat16)                                   # (Cout_p, Bt*Np)

    # conv2's input was produced in-kernel, so its 9-neighbour gather uses the precomputed
    # one-hot matrices (exact gather: one bf16 1.0 per column, f32 accumulation).  The gather
    # is within-element along pixels, so each element's Np-column slice is handled separately.
    # TODO(synk): for large NSIDE replace this O(Np^2) one-hot with a pixel-tiled sel or an
    # in-kernel DMA/indexed gather; it is the only quadratic term left in the kernel.
    g2_slots = []
    for k in range(9):
        sel_k = sel_ref[k]                                                 # (Np, Np) bf16
        cols = [jnp.dot(a2[:, i * Np:(i + 1) * Np], sel_k,
                        preferred_element_type=jnp.float32) for i in range(Bt)]
        g2_slots.append(jnp.concatenate(cols, axis=-1))                    # (Cout_p, Bt*Np) f32
    g2 = jnp.concatenate(g2_slots, axis=0).astype(jnp.bfloat16)            # (9*Cout_p, Bt*Np)

    # ---- conv2: single K = 9*Cout_p dot ----
    y2 = jnp.dot(w2_ref[...], g2, preferred_element_type=jnp.float32) + b2_ref[...]

    # ---- residual 1x1 conv, kept in f32 (tiny matmul, better accuracy) ----
    xall = jnp.concatenate([x_ref[i] for i in range(Bt)], axis=-1)         # (Cin_p, Bt*Np) f32
    res = jnp.dot(wr_ref[...], xall, preferred_element_type=jnp.float32) + br_ref[...]

    out = y2 + res                                                          # (Cout_p, Bt*Np) f32
    for i in range(Bt):
        o_ref[i] = out[:, i * Np:(i + 1) * Np].astype(o_ref.dtype)


# ----------------------------- forward wrapper -----------------------------

def residual_block_forward(x, w1c, b1, w2c, b2, wrc, br, neigh):
    """x: (B, C_in, Npix) f32 (PyTorch NCL layout). Weights in PyTorch Conv1d layout:
    w1c (C_out, C_in, 9), w2c (C_out, C_out, 9), wrc (C_out, C_in, 1). neigh: (Npix, 9) int
    (healpy-style, -1 allowed for missing neighbours).  Returns (B, C_out, Npix) f32."""
    B, C_in, Npix = x.shape
    C_out = w1c.shape[0]

    Np = _round_up(Npix, 128)          # lane-dense pixel dim (unmasked stores, full MXU N)
    Cin_p = _round_up(C_in, 8)
    Cout_p = _round_up(C_out, 8)
    Bt = _choose_batch_tile(B)
    K1, K2 = 9 * Cin_p, 9 * Cout_p

    # healpy returns -1 for missing neighbours; PyTorch advanced indexing wraps -1 to the last
    # pixel, so normalise the same way before building any gather structure.
    neigh_w = jnp.where(neigh < 0, neigh + Npix, neigh).astype(jnp.int32)         # (Npix, 9)
    nbT = jnp.pad(neigh_w.T, ((0, 0), (0, Np - Npix)))                            # (9, Np)

    # conv1 operand: pre-gather LeakyReLU(x) here (cheap O(Npix) XLA gather on a tiny tensor);
    # LeakyReLU commutes with the gather so it is applied once on the small un-gathered x.
    a1 = jnp.pad(_leaky(x), ((0, 0), (0, Cin_p - C_in), (0, Np - Npix)))          # (B, Cin_p, Np)
    xg = a1[:, :, nbT]                                                             # (B, Cin_p, 9, Np)
    xg = jnp.transpose(xg, (0, 2, 1, 3)).reshape(B, K1, Np).astype(jnp.bfloat16)   # k-major K axis

    x_p = jnp.pad(x, ((0, 0), (0, Cin_p - C_in), (0, Np - Npix)))                  # residual path

    # conv2 gather: one-hot selection matrices built ONCE here (not per grid step); constant
    # index_map below means they are DMA'd a single time and stay resident in VMEM.
    row = lax.broadcasted_iota(jnp.int32, (9, Np, Np), 1)
    sel = (row == nbT[:, None, :]).astype(jnp.bfloat16)                            # sel[k,q,j]=(q==nb[j,k])

    # Conv1d weights (C_out, C_in, 9) -> (Cout_p, 9*C_p) with K index = k*C_p + c, matching the
    # gathered-operand layout, so each spherical conv is ONE wide-K dot instead of 9 tiny ones.
    def pack_w(w, co_p, ci_p):
        co, ci, kk = w.shape
        wp = jnp.pad(w, ((0, co_p - co), (0, ci_p - ci), (0, 0)))
        return jnp.transpose(wp, (0, 2, 1)).reshape(co_p, kk * ci_p).astype(jnp.bfloat16)

    w1_p = pack_w(w1c, Cout_p, Cin_p)                                              # (Cout_p, K1)
    w2_p = pack_w(w2c, Cout_p, Cout_p)                                             # (Cout_p, K2)
    wr_p = jnp.pad(wrc[:, :, 0], ((0, Cout_p - C_out), (0, Cin_p - C_in))).astype(jnp.float32)

    def pack_b(b):
        return jnp.pad(b, (0, Cout_p - C_out)).reshape(Cout_p, 1).astype(jnp.float32)

    b1_p, b2_p, br_p = pack_b(b1), pack_b(b2), pack_b(br)

    out_p = pl.pallas_call(
        _residual_block_kernel,
        out_shape=jax.ShapeDtypeStruct((B, Cout_p, Np), x.dtype),
        grid=(B // Bt,),
        in_specs=[
            pl.BlockSpec((Bt, K1, Np), lambda b: (b, 0, 0)),        # pre-gathered conv1 operand
            pl.BlockSpec((Bt, Cin_p, Np), lambda b: (b, 0, 0)),     # raw x (residual)
            pl.BlockSpec((9, Np, Np), lambda b: (0, 0, 0)),         # sel (resident across grid)
            pl.BlockSpec((Cout_p, K1), lambda b: (0, 0)),           # w1
            pl.BlockSpec((Cout_p, 1), lambda b: (0, 0)),            # b1
            pl.BlockSpec((Cout_p, K2), lambda b: (0, 0)),           # w2
            pl.BlockSpec((Cout_p, 1), lambda b: (0, 0)),            # b2
            pl.BlockSpec((Cout_p, Cin_p), lambda b: (0, 0)),        # wr
            pl.BlockSpec((Cout_p, 1), lambda b: (0, 0)),            # br
        ],
        out_specs=pl.BlockSpec((Bt, Cout_p, Np), lambda b: (b, 0, 0)),
        compiler_params=pltpu.CompilerParams(
            dimension_semantics=("parallel",),                      # batch tiles -> both TCs on v7x
            vmem_limit_bytes=_derive_vmem_limit(Bt, Cin_p, Cout_p, Np),
        ),
    )(xg, x_p, sel, w1_p, b1_p, w2_p, b2_p, wr_p, br_p)

    return out_p[:, :C_out, :Npix]


# ----------------------------- helpers (glue) -----------------------------

def synthetic_neighbours(npix):
    # TODO(synk): the real sphericalConv builds this table with healpy.get_all_neighbours
    # (nested HEALPix neighbours, centre pixel at slot 4); healpy is not available in-script,
    # so build a deterministic synthetic (Npix, 9) table with identical gather semantics,
    # including a few -1 "missing neighbour" markers (healpy convention) to exercise the
    # wrap-to-last-pixel indexing path.
    offs = np.array([-4, -3, -2, -1, 0, 1, 2, 3, 4], dtype=np.int64)
    idx = (np.arange(npix)[:, None] + offs[None, :]) % npix
    idx[::7, 8] = -1
    return jnp.asarray(idx, dtype=jnp.int32)


def reference(x, w1c, b1, w2c, b2, wrc, br, neigh):
    # Pure-JAX f32 reference mirroring the PyTorch module exactly (negative neighbour indices
    # wrap to the last pixel, like torch advanced indexing).
    npix = x.shape[-1]
    neigh_w = jnp.where(neigh < 0, neigh + npix, neigh)

    def sconv(v, w, b):
        g = v[:, :, neigh_w.reshape(-1)]                 # (B, C, Npix*9)
        Bc, C, _ = g.shape
        g = g.reshape(Bc, C, -1, 9)                      # (B, C, Npix, 9)
        return jnp.einsum("ock,bcpk->bop", w, g) + b[None, :, None]

    a = _leaky(x)
    y = sconv(a, w1c, b1)
    y = _leaky(y)
    y = sconv(y, w2c, b2)
    res = jnp.einsum("oc,bcp->bop", wrc[:, :, 0], x) + br[None, :, None]
    return y + res


# ----------------------------- main -----------------------------

if __name__ == "__main__":
    NSIDE = 4
    npix = 12 * NSIDE * NSIDE          # 192 HEALPix pixels
    B, C_in, C_out = 2, 4, 4

    key = jax.random.PRNGKey(0)
    k1, k2, k3, kx = jax.random.split(key, 4)

    def kaiming(k, shape):
        fan_in = int(np.prod(shape[1:]))
        std = float(np.sqrt(2.0 / fan_in))
        return std * jax.random.normal(k, shape, dtype=jnp.float32)

    # PyTorch parameter shapes (kaiming_normal weights, zero biases — as in weights_init()).
    w1c = kaiming(k1, (C_out, C_in, 9))
    b1 = jnp.zeros((C_out,), jnp.float32)
    w2c = kaiming(k2, (C_out, C_out, 9))
    b2 = jnp.zeros((C_out,), jnp.float32)
    wrc = kaiming(k3, (C_out, C_in, 1))
    br = jnp.zeros((C_out,), jnp.float32)

    x = jax.random.normal(kx, (B, C_in, npix), dtype=jnp.float32)
    neigh = synthetic_neighbours(npix)

    fwd = jax.jit(residual_block_forward)
    out = jax.block_until_ready(fwd(x, w1c, b1, w2c, b2, wrc, br, neigh))

    ref = reference(x, w1c, b1, w2c, b2, wrc, br, neigh)
    # bf16 matmul operands (f32 accumulation) for the two spherical convs => loosened tolerance.
    np.testing.assert_allclose(np.asarray(out), np.asarray(ref), rtol=5e-2, atol=5e-2)
    print("KERNEL_OK")
</pallas_src>

<mosaic_0001>
module attributes {stable_mosaic.version = 11 : i64} {
  func.func @_residual_block_kernel(%arg0: i32, %arg1: memref<1x72x256xbf16, #tpu.memory_space<vmem>>, %arg2: memref<1x8x256xf32, #tpu.memory_space<vmem>>, %arg3: memref<9x256x256xbf16, #tpu.memory_space<vmem>>, %arg4: memref<8x72xbf16, #tpu.memory_space<vmem>>, %arg5: memref<8x1xf32, #tpu.memory_space<vmem>>, %arg6: memref<8x72xbf16, #tpu.memory_space<vmem>>, %arg7: memref<8x1xf32, #tpu.memory_space<vmem>>, %arg8: memref<8x8xf32, #tpu.memory_space<vmem>>, %arg9: memref<8x1xf32, #tpu.memory_space<vmem>>, %arg10: memref<1x8x256xf32, #tpu.memory_space<vmem>>) attributes {dimension_semantics = [#tpu.dimension_semantics<parallel>], iteration_bounds = array<i64: 2>, scalar_prefetch = 0 : i64, scratch_operands = 0 : i64, tpu.core_type = #tpu.core_type<tc>, window_params = [{transform_indices = @transform_0, window_bounds = array<i64: 1, 72, 256>}, {transform_indices = @transform_1, window_bounds = array<i64: 1, 8, 256>}, {pipeline_mode = #tpu.pipeline_mode<synchronous>, transform_indices = @transform_2, window_bounds = array<i64: 9, 256, 256>}, {pipeline_mode = #tpu.pipeline_mode<synchronous>, transform_indices = @transform_3, window_bounds = array<i64: 8, 72>}, {pipeline_mode = #tpu.pipeline_mode<synchronous>, transform_indices = @transform_4, window_bounds = array<i64: 8, 1>}, {pipeline_mode = #tpu.pipeline_mode<synchronous>, transform_indices = @transform_5, window_bounds = array<i64: 8, 72>}, {pipeline_mode = #tpu.pipeline_mode<synchronous>, transform_indices = @transform_6, window_bounds = array<i64: 8, 1>}, {pipeline_mode = #tpu.pipeline_mode<synchronous>, transform_indices = @transform_7, window_bounds = array<i64: 8, 8>}, {pipeline_mode = #tpu.pipeline_mode<synchronous>, transform_indices = @transform_8, window_bounds = array<i64: 8, 1>}, {transform_indices = @transform_9, window_bounds = array<i64: 1, 8, 256>}]} {
    %c0 = arith.constant 0 : index
    %c0_0 = arith.constant 0 : index
    %c0_1 = arith.constant 0 : index
    %0 = vector.load %arg1[%c0, %c0_0, %c0_1] : memref<1x72x256xbf16, #tpu.memory_space<vmem>>, vector<1x72x256xbf16>
    %1 = vector.shape_cast %0 : vector<1x72x256xbf16> to vector<72x256xbf16>
    %c0_2 = arith.constant 0 : index
    %c0_3 = arith.constant 0 : index
    %2 = vector.load %arg4[%c0_2, %c0_3] : memref<8x72xbf16, #tpu.memory_space<vmem>>, vector<8x72xbf16>
    %cst = arith.constant dense<0.000000e+00> : vector<8x256xf32>
    %3 = tpu.matmul %2, %1, %cst {dimension_numbers = #tpu.dot_dimension_numbers<[1], [0], [0], [1], [0, 0, 1, 1], [], []>} : vector<8x72xbf16>, vector<72x256xbf16>, vector<8x256xf32> -> vector<8x256xf32>
    %c0_4 = arith.constant 0 : index
    %c0_5 = arith.constant 0 : index
    %4 = vector.load %arg5[%c0_4, %c0_5] : memref<8x1xf32, #tpu.memory_space<vmem>>, vector<8x1xf32>
    %5 = vector.broadcast %4 : vector<8x1xf32> to vector<8x256xf32>
    %6 = arith.addf %3, %5 : vector<8x256xf32>
    %cst_6 = arith.constant 0.000000e+00 : f32
    %7 = vector.broadcast %cst_6 : f32 to vector<8x256xf32>
    %8 = arith.cmpf oge, %6, %7 : vector<8x256xf32>
    %cst_7 = arith.constant 2.000000e-01 : f32
    %9 = vector.broadcast %cst_7 : f32 to vector<8x256xf32>
    %10 = arith.mulf %9, %6 : vector<8x256xf32>
    %11 = arith.select %8, %6, %10 : vector<8x256xi1>, vector<8x256xf32>
    %12 = arith.truncf %11 : vector<8x256xf32> to vector<8x256xbf16>
    %c0_8 = arith.constant 0 : index
    %c0_9 = arith.constant 0 : index
    %c0_10 = arith.constant 0 : index
    %13 = vector.load %arg3[%c0_8, %c0_9, %c0_10] : memref<9x256x256xbf16, #tpu.memory_space<vmem>>, vector<1x256x256xbf16>
    %14 = vector.shape_cast %13 : vector<1x256x256xbf16> to vector<256x256xbf16>
    %cst_11 = arith.constant dense<0.000000e+00> : vector<8x256xf32>
    %15 = tpu.matmul %12, %14, %cst_11 {dimension_numbers = #tpu.dot_dimension_numbers<[1], [0], [0], [1], [0, 0, 1, 1], [], []>} : vector<8x256xbf16>, vector<256x256xbf16>, vector<8x256xf32> -> vector<8x256xf32>
    %c1 = arith.constant 1 : index
    %c0_12 = arith.constant 0 : index
    %c0_13 = arith.constant 0 : index
    %16 = vector.load %arg3[%c1, %c0_12, %c0_13] : memref<9x256x256xbf16, #tpu.memory_space<vmem>>, vector<1x256x256xbf16>
    %17 = vector.shape_cast %16 : vector<1x256x256xbf16> to vector<256x256xbf16>
    %cst_14 = arith.constant dense<0.000000e+00> : vector<8x256xf32>
    %18 = tpu.matmul %12, %17, %cst_14 {dimension_numbers = #tpu.dot_dimension_numbers<[1], [0], [0], [1], [0, 0, 1, 1], [], []>} : vector<8x256xbf16>, vector<256x256xbf16>, vector<8x256xf32> -> vector<8x256xf32>
    %c2 = arith.constant 2 : index
    %c0_15 = arith.constant 0 : index
    %c0_16 = arith.constant 0 : index
    %19 = vector.load %arg3[%c2, %c0_15, %c0_16] : memref<9x256x256xbf16, #tpu.memory_space<vmem>>, vector<1x256x256xbf16>
    %20 = vector.shape_cast %19 : vector<1x256x256xbf16> to vector<256x256xbf16>
    %cst_17 = arith.constant dense<0.000000e+00> : vector<8x256xf32>
    %21 = tpu.matmul %12, %20, %cst_17 {dimension_numbers = #tpu.dot_dimension_numbers<[1], [0], [0], [1], [0, 0, 1, 1], [], []>} : vector<8x256xbf16>, vector<256x256xbf16>, vector<8x256xf32> -> vector<8x256xf32>
    %c3 = arith.constant 3 : index
    %c0_18 = arith.constant 0 : index
    %c0_19 = arith.constant 0 : index
    %22 = vector.load %arg3[%c3, %c0_18, %c0_19] : memref<9x256x256xbf16, #tpu.memory_space<vmem>>, vector<1x256x256xbf16>
    %23 = vector.shape_cast %22 : vector<1x256x256xbf16> to vector<256x256xbf16>
    %cst_20 = arith.constant dense<0.000000e+00> : vector<8x256xf32>
    %24 = tpu.matmul %12, %23, %cst_20 {dimension_numbers = #tpu.dot_dimension_numbers<[1], [0], [0], [1], [0, 0, 1, 1], [], []>} : vector<8x256xbf16>, vector<256x256xbf16>, vector<8x256xf32> -> vector<8x256xf32>
    %c4 = arith.constant 4 : index
    %c0_21 = arith.constant 0 : index
    %c0_22 = arith.constant 0 : index
    %25 = vector.load %arg3[%c4, %c0_21, %c0_22] : memref<9x256x256xbf16, #tpu.memory_space<vmem>>, vector<1x256x256xbf16>
    %26 = vector.shape_cast %25 : vector<1x256x256xbf16> to vector<256x256xbf16>
    %cst_23 = arith.constant dense<0.000000e+00> : vector<8x256xf32>
    %27 = tpu.matmul %12, %26, %cst_23 {dimension_numbers = #tpu.dot_dimension_numbers<[1], [0], [0], [1], [0, 0, 1, 1], [], []>} : vector<8x256xbf16>, vector<256x256xbf16>, vector<8x256xf32> -> vector<8x256xf32>
    %c5 = arith.constant 5 : index
    %c0_24 = arith.constant 0 : index
    %c0_25 = arith.constant 0 : index
    %28 = vector.load %arg3[%c5, %c0_24, %c0_25] : memref<9x256x256xbf16, #tpu.memory_space<vmem>>, vector<1x256x256xbf16>
    %29 = vector.shape_cast %28 : vector<1x256x256xbf16> to vector<256x256xbf16>
    %cst_26 = arith.constant dense<0.000000e+00> : vector<8x256xf32>
    %30 = tpu.matmul %12, %29, %cst_26 {dimension_numbers = #tpu.dot_dimension_numbers<[1], [0], [0], [1], [0, 0, 1, 1], [], []>} : vector<8x256xbf16>, vector<256x256xbf16>, vector<8x256xf32> -> vector<8x256xf32>
    %c6 = arith.constant 6 : index
    %c0_27 = arith.constant 0 : index
    %c0_28 = arith.constant 0 : index
    %31 = vector.load %arg3[%c6, %c0_27, %c0_28] : memref<9x256x256xbf16, #tpu.memory_space<vmem>>, vector<1x256x256xbf16>
    %32 = vector.shape_cast %31 : vector<1x256x256xbf16> to vector<256x256xbf16>
    %cst_29 = arith.constant dense<0.000000e+00> : vector<8x256xf32>
    %33 = tpu.matmul %12, %32, %cst_29 {dimension_numbers = #tpu.dot_dimension_numbers<[1], [0], [0], [1], [0, 0, 1, 1], [], []>} : vector<8x256xbf16>, vector<256x256xbf16>, vector<8x256xf32> -> vector<8x256xf32>
    %c7 = arith.constant 7 : index
    %c0_30 = arith.constant 0 : index
    %c0_31 = arith.constant 0 : index
    %34 = vector.load %arg3[%c7, %c0_30, %c0_31] : memref<9x256x256xbf16, #tpu.memory_space<vmem>>, vector<1x256x256xbf16>
    %35 = vector.shape_cast %34 : vector<1x256x256xbf16> to vector<256x256xbf16>
    %cst_32 = arith.constant dense<0.000000e+00> : vector<8x256xf32>
    %36 = tpu.matmul %12, %35, %cst_32 {dimension_numbers = #tpu.dot_dimension_numbers<[1], [0], [0], [1], [0, 0, 1, 1], [], []>} : vector<8x256xbf16>, vector<256x256xbf16>, vector<8x256xf32> -> vector<8x256xf32>
    %c8 = arith.constant 8 : index
    %c0_33 = arith.constant 0 : index
    %c0_34 = arith.constant 0 : index
    %37 = vector.load %arg3[%c8, %c0_33, %c0_34] : memref<9x256x256xbf16, #tpu.memory_space<vmem>>, vector<1x256x256xbf16>
    %38 = vector.shape_cast %37 : vector<1x256x256xbf16> to vector<256x256xbf16>
    %cst_35 = arith.constant dense<0.000000e+00> : vector<8x256xf32>
    %39 = tpu.matmul %12, %38, %cst_35 {dimension_numbers = #tpu.dot_dimension_numbers<[1], [0], [0], [1], [0, 0, 1, 1], [], []>} : vector<8x256xbf16>, vector<256x256xbf16>, vector<8x256xf32> -> vector<8x256xf32>
    %40 = tpu.concatenate %15, %18, %21, %24, %27, %30, %33, %36, %39 in 0 : vector<8x256xf32>, vector<8x256xf32>, vector<8x256xf32>, vector<8x256xf32>, vector<8x256xf32>, vector<8x256xf32>, vector<8x256xf32>, vector<8x256xf32>, vector<8x256xf32> -> vector<72x256xf32>
    %41 = arith.truncf %40 : vector<72x256xf32> to vector<72x256xbf16>
    %c0_36 = arith.constant 0 : index
    %c0_37 = arith.constant 0 : index
    %42 = vector.load %arg6[%c0_36, %c0_37] : memref<8x72xbf16, #tpu.memory_space<vmem>>, vector<8x72xbf16>
    %cst_38 = arith.constant dense<0.000000e+00> : vector<8x256xf32>
    %43 = tpu.matmul %42, %41, %cst_38 {dimension_numbers = #tpu.dot_dimension_numbers<[1], [0], [0], [1], [0, 0, 1, 1], [], []>} : vector<8x72xbf16>, vector<72x256xbf16>, vector<8x256xf32> -> vector<8x256xf32>
    %c0_39 = arith.constant 0 : index
    %c0_40 = arith.constant 0 : index
    %44 = vector.load %arg7[%c0_39, %c0_40] : memref<8x1xf32, #tpu.memory_space<vmem>>, vector<8x1xf32>
    %45 = vector.broadcast %44 : vector<8x1xf32> to vector<8x256xf32>
    %46 = arith.addf %43, %45 : vector<8x256xf32>
    %c0_41 = arith.constant 0 : index
    %c0_42 = arith.constant 0 : index
    %c0_43 = arith.constant 0 : index
    %47 = vector.load %arg2[%c0_41, %c0_42, %c0_43] : memref<1x8x256xf32, #tpu.memory_space<vmem>>, vector<1x8x256xf32>
    %48 = vector.shape_cast %47 : vector<1x8x256xf32> to vector<8x256xf32>
    %c0_44 = arith.constant 0 : index
    %c0_45 = arith.constant 0 : index
    %49 = vector.load %arg8[%c0_44, %c0_45] : memref<8x8xf32, #tpu.memory_space<vmem>>, vector<8x8xf32>
    %cst_46 = arith.constant dense<0.000000e+00> : vector<8x256xf32>
    %50 = tpu.matmul %49, %48, %cst_46 {dimension_numbers = #tpu.dot_dimension_numbers<[1], [0], [0], [1], [0, 0, 1, 1], [], []>} : vector<8x8xf32>, vector<8x256xf32>, vector<8x256xf32> -> vector<8x256xf32>
    %c0_47 = arith.constant 0 : index
    %c0_48 = arith.constant 0 : index
    %51 = vector.load %arg9[%c0_47, %c0_48] : memref<8x1xf32, #tpu.memory_space<vmem>>, vector<8x1xf32>
    %52 = vector.broadcast %51 : vector<8x1xf32> to vector<8x256xf32>
    %53 = arith.addf %50, %52 : vector<8x256xf32>
    %54 = arith.addf %46, %53 : vector<8x256xf32>
    %c0_49 = arith.constant 0 : index
    %c0_50 = arith.constant 0 : index
    %c0_51 = arith.constant 0 : index
    %55 = vector.load %arg10[%c0_49, %c0_50, %c0_51] : memref<1x8x256xf32, #tpu.memory_space<vmem>>, vector<1x8x256xf32>
    %56 = vector.shape_cast %55 : vector<1x8x256xf32> to vector<8x256xf32>
    %57 = vector.shape_cast %54 : vector<8x256xf32> to vector<1x8x256xf32>
    tpu.vector_store %arg10[%c0_49, %c0_50, %c0_51], %57 {strides = array<i32>} : memref<1x8x256xf32, #tpu.memory_space<vmem>>, vector<1x8x256xf32>,
    return
  }
  func.func @transform_0(%arg0: i32) -> (i32, i32, i32) {
    %c0_i32 = arith.constant 0 : i32
    %c0_i32_0 = arith.constant 0 : i32
    %c0_i32_1 = arith.constant 0 : i32
    return %arg0, %c0_i32, %c0_i32_0 : i32, i32, i32
  }
  func.func @transform_1(%arg0: i32) -> (i32, i32, i32) {
    %c0_i32 = arith.constant 0 : i32
    %c0_i32_0 = arith.constant 0 : i32
    %c0_i32_1 = arith.constant 0 : i32
    return %arg0, %c0_i32, %c0_i32_0 : i32, i32, i32
  }
  func.func @transform_2(%arg0: i32) -> (i32, i32, i32) {
    %c0_i32 = arith.constant 0 : i32
    %c0_i32_0 = arith.constant 0 : i32
    %c0_i32_1 = arith.constant 0 : i32
    %c0_i32_2 = arith.constant 0 : i32
    return %c0_i32, %c0_i32_0, %c0_i32_1 : i32, i32, i32
  }
  func.func @transform_3(%arg0: i32) -> (i32, i32) {
    %c0_i32 = arith.constant 0 : i32
    %c0_i32_0 = arith.constant 0 : i32
    %c0_i32_1 = arith.constant 0 : i32
    return %c0_i32, %c0_i32_0 : i32, i32
  }
  func.func @transform_4(%arg0: i32) -> (i32, i32) {
    %c0_i32 = arith.constant 0 : i32
    %c0_i32_0 = arith.constant 0 : i32
    %c0_i32_1 = arith.constant 0 : i32
    return %c0_i32, %c0_i32_0 : i32, i32
  }
  func.func @transform_5(%arg0: i32) -> (i32, i32) {
    %c0_i32 = arith.constant 0 : i32
    %c0_i32_0 = arith.constant 0 : i32
    %c0_i32_1 = arith.constant 0 : i32
    return %c0_i32, %c0_i32_0 : i32, i32
  }
  func.func @transform_6(%arg0: i32) -> (i32, i32) {
    %c0_i32 = arith.constant 0 : i32
    %c0_i32_0 = arith.constant 0 : i32
    %c0_i32_1 = arith.constant 0 : i32
    return %c0_i32, %c0_i32_0 : i32, i32
  }
  func.func @transform_7(%arg0: i32) -> (i32, i32) {
    %c0_i32 = arith.constant 0 : i32
    %c0_i32_0 = arith.constant 0 : i32
    %c0_i32_1 = arith.constant 0 : i32
    return %c0_i32, %c0_i32_0 : i32, i32
  }
  func.func @transform_8(%arg0: i32) -> (i32, i32) {
    %c0_i32 = arith.constant 0 : i32
    %c0_i32_0 = arith.constant 0 : i32
    %c0_i32_1 = arith.constant 0 : i32
    return %c0_i32, %c0_i32_0 : i32, i32
  }
  func.func @transform_9(%arg0: i32) -> (i32, i32, i32) {
    %c0_i32 = arith.constant 0 : i32
    %c0_i32_0 = arith.constant 0 : i32
    %c0_i32_1 = arith.constant 0 : i32
    return %arg0, %c0_i32, %c0_i32_0 : i32, i32, i32
  }
}

</mosaic_0001>

<bundles_post_ra>
// kernel: residual_block_forward.1
= control target key start
LH: loop header
LB: loop body
LE: loop exit
PB: predicated region body
PF: predicated region fallthrough
CT: control target
= control target key end

     0   :  { %s3894_s30 = smov 0   ;;  %s4861_s0 = inlined_call_operand.vmem [shape: bf16[2,72,256], index: 0, kind: input, shape index: {}]   ;;  %s4862_s1 = inlined_call_operand.vmem [shape: f32[2,8,256], index: 1, kind: input, shape index: {}]   ;;  %s4863_s2 = inlined_call_operand.vmem [shape: bf16[9,256,256], index: 2, kind: input, shape index: {}]   ;;  %s4864_s3 = inlined_call_operand.vmem [shape: bf16[8,72], index: 3, kind: input, shape index: {}]   ;;  %s4865_s4 = inlined_call_operand.vmem [shape: f32[8,1], index: 4, kind: input, shape index: {}]   ;;  %s4866_s5 = inlined_call_operand.vmem [shape: bf16[8,72], index: 5, kind: input, shape index: {}]   ;;  %s4867_s6 = inlined_call_operand.vmem [shape: f32[8,1], index: 6, kind: input, shape index: {}]   ;;  %s4868_s7 = inlined_call_operand.vmem [shape: f32[8,8], index: 7, kind: input, shape index: {}]   ;;  %s4869_s8 = inlined_call_operand.vmem [shape: f32[8,1], index: 8, kind: input, shape index: {}]   ;;  %s4870_s9 = inlined_call_operand.vmem [shape: f32[2,8,256], index: 9, kind: output, shape index: {}]  }
   0x1 LB: > { %s2802_s10 = sadd.s32 4294967295, %s3840_s30   ;;  %p2806_p0 = scmp.ge.s32.totalorder %s3840_s30, 1  ;;  %s3840_s30 = sphi %s3894_s30, %s19_s30  }
   0x2   : > { %p297_p1 = scmp.lt.s32.totalorder %s3840_s30, 3 }
   0x4   : > { %p298_p2 = pnand %p2806_p0, %p297_p1 }
   0x5   : > { %p338_p3 = scmp.lt.s32.totalorder (!%p298_p2), %s2802_s10, 1 }
   0x6   : > { %301 = sbr.rel (%p298_p2) target bundleno = 922 (0x39a), region = 56 }
   0xb   : > { %v3842_v0 = vmov 0   ;;  %v364_v1 = vld [vmem:[%s4865_s4] sm:$0xff]  ;;  %s4872_s10 = smov (!%p338_p3, %s2802_s10), 1  ;;  %v3402_v2 = vld [vmem:[%s4863_s2 + $0x74] ss:$8 sps:$4 sm:$0xff]   ;;  %vm419_vm0 = vcmask 1043456  }
   0xc   : > { %458 = vmatprep.mubr.bf16.mxu0 %v3842_v0  ;;  %3386 = vset.pattern.permute.xlu0 %v3842_v0  ;;  %v2591_v3 = vld [vmem:[%s4867_s6] sm:$0xff]  ;;  %s3375_s17 = smul.u32 72, %s4872_s10  ;;  %v3407_v4 = vld [vmem:[%s4863_s2 + $0x70] ss:$8 sps:$4 sm:$0xff]   ;;  %v3414_v14 = vld [vmem:[%s4863_s2 + $0x54] ss:$8 sps:$4 sm:$0xff]  }
   0xd   : > { %367 = vperm.xlu0 %3386, %v364_v1   ;;  %3387 = vset.pattern.permute.xlu1 %v3842_v0  ;;  %v3408_v5 = vld [vmem:[%s4863_s2 + $0x64] ss:$8 sps:$4 sm:$0xff]   ;;  %v3413_v6 = vld [vmem:[%s4863_s2 + $0x60] ss:$8 sps:$4 sm:$0xff]   ;;  %v3419_v17 = vld [vmem:[%s4863_s2 + $0x50] ss:$8 sps:$4 sm:$0xff]  }
   0xe   : > { %667 = vmatprep.subr.bf16.mxu1 %v3402_v2  ;;  %s3926_s24 = scalar_lea.vmem %s4861_s0, %s3375_s17  ;;  %v3420_v18 = vld [vmem:[%s4863_s2 + $0x44] ss:$8 sps:$4 sm:$0xff]   ;;  %v3425_v19 = vld [vmem:[%s4863_s2 + $0x40] ss:$8 sps:$4 sm:$0xff]   ;;  %v3426_v20 = vld [vmem:[%s4863_s2 + $0x34] ss:$8 sps:$4 sm:$0xff]  }
   0xf   : > { %668 = vmatpush1.bf16.msra.mxu1 %v3407_v4  ;;  %v362_v7 = vld [vmem:[%s3926_s24 + $0x40] sm:$0xff]  ;;  %v3390_v10 = vld [vmem:[%s3926_s24 + $0x34] ss:$8 sps:$4 sm:$0xff]   ;;  %v3392_v12 = vld [vmem:[%s3926_s24 + $0x30] ss:$8 sps:$4 sm:$0xff]   ;;  %vm415_vm1 = vcmask 588800  }
  0x10   : > { %669 = vmatprep.subr.bf16.mxu1 %v3408_v5  ;;  %v2821_v8 = vcombine.high %v362_v7, %v362_v7  ;;  %v2820_v9 = vcombine.low %v362_v7, %v362_v7  ;;  %v3393_v13 = vld [vmem:[%s3926_s24 + $0x24] ss:$8 sps:$4 sm:$0xff]   ;;  %v3395_v15 = vld [vmem:[%s3926_s24 + $0x20] ss:$8 sps:$4 sm:$0xff]   ;;  %v3396_v16 = vld [vmem:[%s3926_s24 + $0x14] ss:$8 sps:$4 sm:$0xff]  }
  0x11   : > { %2594 = vperm.xlu0 %3386, %v2591_v3   ;;  %v3398_v21 = vld [vmem:[%s3926_s24 + $0x10] ss:$8 sps:$4 sm:$0xff]   ;;  %v3399_v22 = vld [vmem:[%s3926_s24 + $0x4] ss:$8 sps:$4 sm:$0xff]   ;;  %v3401_v25 = vld [vmem:[%s3926_s24] ss:$8 sps:$4 sm:$0xff]  }
  0x12   : > { %2822 = vmatprep.subr.msk.bf16.mxu0 %vm419_vm0, %v2821_v8  ;;  %v421_v11 = vsel %vm419_vm0, %v2820_v9, 0  ;;  %v3431_v23 = vld [vmem:[%s4863_s2 + $0x30] ss:$8 sps:$4 sm:$0xff]   ;;  %v3432_v24 = vld [vmem:[%s4863_s2 + $0x24] ss:$8 sps:$4 sm:$0xff]   ;;  %s3373_s11 = sshll.u32 %s4872_s10, 4 }
  0x13   : > { %670 = vmatpush1.bf16.msra.mxu1 %v3413_v6  ;;  %433 = vmatpush1.bf16.msra.mxu0 %v421_v11  ;;  %v3406_v26 = vld [vmem:[%s4863_s2 + $0x174] ss:$8 sps:$4 sm:$0xff]   ;;  %v363_v27 = vld [vmem:[%s4864_s3] sm:$0xf]  ;;  %v3404_v30 = vld [vmem:[%s4863_s2 + $0x170] ss:$8 sps:$4 sm:$0xff]   ;;  %s347_s13 = scalar_lea.vmem %s4862_s1, %s3373_s11  ;;  %s352_s19 = scalar_lea.vmem %s4870_s9, %s3373_s11 }
  0x14   : > { %434 = vmatprep.subr.bf16.mxu0 %v3390_v10  ;;  %671 = vmatprep.subr.bf16.mxu1 %v3414_v14  ;;  %v3437_v28 = vld [vmem:[%s4863_s2 + $0x20] ss:$8 sps:$4 sm:$0xff]   ;;  %v3438_v29 = vld [vmem:[%s4863_s2 + $0x14] ss:$8 sps:$4 sm:$0xff]   ;;  %v3412_v31 = vld [vmem:[%s4863_s2 + $0x164] ss:$8 sps:$4 sm:$0xff]  }
  0x15   : > { %v3443_v32 = vld [vmem:[%s4863_s2 + $0x10] ss:$8 sps:$4 sm:$0xff]   ;;  %v3444_v33 = vld [vmem:[%s4863_s2 + $0x4] ss:$8 sps:$4 sm:$0xff]   ;;  %v3410_v34 = vld [vmem:[%s4863_s2 + $0x160] ss:$8 sps:$4 sm:$0xff]  }
  0x16   : > { %v3418_v35 = vld [vmem:[%s4863_s2 + $0x154] ss:$8 sps:$4 sm:$0xff]   ;;  %v3449_v36 = vld [vmem:[%s4863_s2] ss:$8 sps:$4 sm:$0xff]   ;;  %v3416_v38 = vld [vmem:[%s4863_s2 + $0x150] ss:$8 sps:$4 sm:$0xff]  }
  0x17   : > { %435 = vmatpush1.bf16.msra.mxu0 %v3392_v12  ;;  %672 = vmatpush1.bf16.msra.mxu1 %v3419_v17  ;;  %v3450_v37 = vld [vmem:[%s4863_s2 + $0xf4] ss:$8 sps:$4 sm:$0xff]   ;;  %v3424_v39 = vld [vmem:[%s4863_s2 + $0x144] ss:$8 sps:$4 sm:$0xff]   ;;  %v3455_v40 = vld [vmem:[%s4863_s2 + $0xf0] ss:$8 sps:$4 sm:$0xff]  }
  0x18   : > { %436 = vmatprep.subr.bf16.mxu0 %v3393_v13  ;;  %673 = vmatprep.subr.bf16.mxu1 %v3420_v18  ;;  %v3456_v41 = vld [vmem:[%s4863_s2 + $0xe4] ss:$8 sps:$4 sm:$0xff]   ;;  %v3422_v42 = vld [vmem:[%s4863_s2 + $0x140] ss:$8 sps:$4 sm:$0xff]   ;;  %v3430_v43 = vld [vmem:[%s4863_s2 + $0x134] ss:$8 sps:$4 sm:$0xff]  }
  0x19   : > { %v3428_v44 = vld [vmem:[%s4863_s2 + $0x130] ss:$8 sps:$4 sm:$0xff]   ;;  %v3461_v45 = vld [vmem:[%s4863_s2 + $0xe0] ss:$8 sps:$4 sm:$0xff]   ;;  %v3462_v46 = vld [vmem:[%s4863_s2 + $0xd4] ss:$8 sps:$4 sm:$0xff]  }
  0x1a   : > { %v3436_v47 = vld [vmem:[%s4863_s2 + $0x124] ss:$8 sps:$4 sm:$0xff]   ;;  %v3467_v48 = vld [vmem:[%s4863_s2 + $0xd0] ss:$8 sps:$4 sm:$0xff]   ;;  %v3434_v50 = vld [vmem:[%s4863_s2 + $0x120] ss:$8 sps:$4 sm:$0xff]  }
  0x1b   : > { %437 = vmatpush1.bf16.msra.mxu0 %v3395_v15  ;;  %674 = vmatpush1.bf16.msra.mxu1 %v3425_v19  ;;  %v3468_v49 = vld [vmem:[%s4863_s2 + $0xc4] ss:$8 sps:$4 sm:$0xff]   ;;  %v3442_v51 = vld [vmem:[%s4863_s2 + $0x114] ss:$8 sps:$4 sm:$0xff]   ;;  %v3473_v52 = vld [vmem:[%s4863_s2 + $0xc0] ss:$8 sps:$4 sm:$0xff]  }
  0x1c   : > { %438 = vmatprep.subr.bf16.mxu0 %v3396_v16  ;;  %675 = vmatprep.subr.bf16.mxu1 %v3426_v20  ;;  %v3474_v53 = vld [vmem:[%s4863_s2 + $0xb4] ss:$8 sps:$4 sm:$0xff]   ;;  %v3440_v54 = vld [vmem:[%s4863_s2 + $0x110] ss:$8 sps:$4 sm:$0xff]   ;;  %v3448_v55 = vld [vmem:[%s4863_s2 + $0x104] ss:$8 sps:$4 sm:$0xff]  }
  0x1d   : > { %v3479_v56 = vld [vmem:[%s4863_s2 + $0xb0] ss:$8 sps:$4 sm:$0xff]   ;;  %v3480_v57 = vld [vmem:[%s4863_s2 + $0xa4] ss:$8 sps:$4 sm:$0xff]   ;;  %v3446_v58 = vld [vmem:[%s4863_s2 + $0x100] ss:$8 sps:$4 sm:$0xff]  }
  0x1e   : > { %v3454_v59 = vld [vmem:[%s4863_s2 + $0x1f4] ss:$8 sps:$4 sm:$0xff]   ;;  %v3485_v60 = vld [vmem:[%s4863_s2 + $0xa0] ss:$8 sps:$4 sm:$0xff]   ;;  %v3452_v61 = vld [vmem:[%s4863_s2 + $0x1f0] ss:$8 sps:$4 sm:$0xff]  }
  0x1f   : > { %439 = vmatpush1.bf16.msra.mxu0 %v3398_v21  ;;  %676 = vmatpush1.bf16.msra.mxu1 %v3431_v23  ;;  %v3460_v62 = vld [vmem:[%s4863_s2 + $0x1e4] ss:$8 sps:$4 sm:$0xff]   ;;  %v3458_v63 = vld [vmem:[%s4863_s2 + $0x1e0] ss:$8 sps:$4 sm:$0xff]   ;;  %v3466_v1 = vld [vmem:[%s4863_s2 + $0x1d4] ss:$8 sps:$4 sm:$0xff]  }
  0x20   : > { %440 = vmatprep.subr.bf16.mxu0 %v3399_v22  ;;  %677 = vmatprep.subr.bf16.mxu1 %v3432_v24  ;;  %v3464_v2 = vld [vmem:[%s4863_s2 + $0x1d0] ss:$8 sps:$4 sm:$0xff]   ;;  %v3472_v3 = vld [vmem:[%s4863_s2 + $0x1c4] ss:$8 sps:$4 sm:$0xff]   ;;  %v3470_v4 = vld [vmem:[%s4863_s2 + $0x1c0] ss:$8 sps:$4 sm:$0xff]  }
  0x21   : > { %v3478_v5 = vld [vmem:[%s4863_s2 + $0x1b4] ss:$8 sps:$4 sm:$0xff]   ;;  %v3476_v6 = vld [vmem:[%s4863_s2 + $0x1b0] ss:$8 sps:$4 sm:$0xff]   ;;  %v3484_v7 = vld [vmem:[%s4863_s2 + $0x1a4] ss:$8 sps:$4 sm:$0xff]  }
  0x22   : > { %v3482_v8 = vld [vmem:[%s4863_s2 + $0x1a0] ss:$8 sps:$4 sm:$0xff]   ;;  %v3486_v9 = vld [vmem:[%s4863_s2 + $0x94] ss:$8 sps:$4 sm:$0xff]   ;;  %v3488_v11 = vld [vmem:[%s4863_s2 + $0x190] ss:$8 sps:$4 sm:$0xff]  }
  0x23   : > { %441 = vmatpush1.bf16.msra.mxu0 %v3401_v25  ;;  %678 = vmatpush1.bf16.msra.mxu1 %v3437_v28  ;;  %v3490_v10 = vld [vmem:[%s4863_s2 + $0x194] ss:$8 sps:$4 sm:$0xff]   ;;  %v3491_v12 = vld [vmem:[%s4863_s2 + $0x90] ss:$8 sps:$4 sm:$0xff]   ;;  %v3492_v13 = vld [vmem:[%s4863_s2 + $0x84] ss:$8 sps:$4 sm:$0xff]  }
  0x24   : > { %901 = vmatprep.subr.bf16.mxu0 %v3406_v26  ;;  %679 = vmatprep.subr.bf16.mxu1 %v3438_v29  ;;  %v3496_v14 = vld [vmem:[%s4863_s2 + $0x184] ss:$8 sps:$4 sm:$0xff]   ;;  %v3494_v15 = vld [vmem:[%s4863_s2 + $0x180] ss:$8 sps:$4 sm:$0xff]   ;;  %v3500_v17 = vld [vmem:[%s4863_s2 + $0x274] ss:$8 sps:$4 sm:$0xff]  }
  0x25   : > { %v3497_v16 = vld [vmem:[%s4863_s2 + $0x80] ss:$8 sps:$4 sm:$0xff]   ;;  %v3503_v18 = vld [vmem:[%s4863_s2 + $0x374] ss:$8 sps:$4 sm:$0xff]   ;;  %vm2656_vm4 = vcmask 64512  }
  0x26   : > { %2823 = vmatmul.mubr.msk.bf16.vlgmr.msra.gmra.mxu0 %vm415_vm1, %v363_v27 }
  0x27   : > { %902 = vmatpush1.bf16.msra.mxu0 %v3404_v30  ;;  %680 = vmatpush1.bf16.msra.mxu1 %v3443_v32  ;;  %v3501_v32 = vld [vmem:[%s4863_s2 + $0x370] ss:$8 sps:$4 sm:$0xff]  }
  0x28   : > { %903 = vmatprep.subr.bf16.mxu0 %v3412_v31  ;;  %681 = vmatprep.subr.bf16.mxu1 %v3444_v33  ;;  %v3498_v31 = vld [vmem:[%s4863_s2 + $0x270] ss:$8 sps:$4 sm:$0xff]  }
  0x2b   : > { %904 = vmatpush1.bf16.msra.mxu0 %v3410_v34  ;;  %682 = vmatpush1.bf16.msra.mxu1 %v3449_v36  ;;  %v3506_v34 = vld [vmem:[%s4863_s2 + $0x264] ss:$8 sps:$4 sm:$0xff]   ;;  %v3504_v36 = vld [vmem:[%s4863_s2 + $0x260] ss:$8 sps:$4 sm:$0xff]  }
  0x2c   : > { %905 = vmatprep.subr.bf16.mxu0 %v3418_v35  ;;  %683 = vmatprep.subr.bf16.mxu1 %v3450_v37  ;;  %v3509_v35 = vld [vmem:[%s4863_s2 + $0x364] ss:$8 sps:$4 sm:$0xff]   ;;  %v3507_v37 = vld [vmem:[%s4863_s2 + $0x360] ss:$8 sps:$4 sm:$0xff]  }
  0x2f   : > { %906 = vmatpush1.bf16.msra.mxu0 %v3416_v38  ;;  %684 = vmatpush2.bf16.msra.mxu1 %v3455_v40  ;;  %v3512_v38 = vld [vmem:[%s4863_s2 + $0x254] ss:$8 sps:$4 sm:$0xff]   ;;  %v3510_v40 = vld [vmem:[%s4863_s2 + $0x250] ss:$8 sps:$4 sm:$0xff]  }
  0x30   : > { %907 = vmatprep.subr.bf16.mxu0 %v3424_v39  ;;  %685 = vmatprep.subr.bf16.mxu1 %v3456_v41  ;;  %v3515_v39 = vld [vmem:[%s4863_s2 + $0x354] ss:$8 sps:$4 sm:$0xff]   ;;  %v3513_v41 = vld [vmem:[%s4863_s2 + $0x350] ss:$8 sps:$4 sm:$0xff]  }
  0x33   : > { %908 = vmatpush1.bf16.msra.mxu0 %v3422_v42  ;;  %686 = vmatpush2.bf16.msra.mxu1 %v3461_v45  ;;  %v3518_v42 = vld [vmem:[%s4863_s2 + $0x244] ss:$8 sps:$4 sm:$0xff]   ;;  %v3519_v45 = vld [vmem:[%s4863_s2 + $0x340] ss:$8 sps:$4 sm:$0xff]  }
  0x34   : > { %909 = vmatprep.subr.bf16.mxu0 %v3430_v43  ;;  %687 = vmatprep.subr.bf16.mxu1 %v3462_v46  ;;  %v3521_v43 = vld [vmem:[%s4863_s2 + $0x344] ss:$8 sps:$4 sm:$0xff]   ;;  %v3524_v46 = vld [vmem:[%s4863_s2 + $0x234] ss:$8 sps:$4 sm:$0xff]  }
  0x37   : > { %910 = vmatpush1.bf16.msra.mxu0 %v3428_v44  ;;  %688 = vmatpush2.bf16.msra.mxu1 %v3467_v48  ;;  %v3516_v44 = vld [vmem:[%s4863_s2 + $0x240] ss:$8 sps:$4 sm:$0xff]   ;;  %v3522_v48 = vld [vmem:[%s4863_s2 + $0x230] ss:$8 sps:$4 sm:$0xff]  }
  0x38   : > { %911 = vmatprep.subr.bf16.mxu0 %v3436_v47  ;;  %689 = vmatprep.subr.bf16.mxu1 %v3468_v49  ;;  %v3527_v47 = vld [vmem:[%s4863_s2 + $0x334] ss:$8 sps:$4 sm:$0xff]   ;;  %v3525_v49 = vld [vmem:[%s4863_s2 + $0x330] ss:$8 sps:$4 sm:$0xff]  }
  0x3b   : > { %912 = vmatpush1.bf16.msra.mxu0 %v3434_v50  ;;  %690 = vmatpush2.bf16.msra.mxu1 %v3473_v52  ;;  %v3530_v50 = vld [vmem:[%s4863_s2 + $0x224] ss:$8 sps:$4 sm:$0xff]   ;;  %v3528_v52 = vld [vmem:[%s4863_s2 + $0x220] ss:$8 sps:$4 sm:$0xff]  }
  0x3c   : > { %913 = vmatprep.subr.bf16.mxu0 %v3442_v51  ;;  %691 = vmatprep.subr.bf16.mxu1 %v3474_v53  ;;  %v3533_v51 = vld [vmem:[%s4863_s2 + $0x324] ss:$8 sps:$4 sm:$0xff]   ;;  %v3531_v53 = vld [vmem:[%s4863_s2 + $0x320] ss:$8 sps:$4 sm:$0xff]  }
  0x3f   : > { %914 = vmatpush1.bf16.msra.mxu0 %v3440_v54  ;;  %692 = vmatpush2.bf16.msra.mxu1 %v3479_v56  ;;  %v3536_v54 = vld [vmem:[%s4863_s2 + $0x214] ss:$8 sps:$4 sm:$0xff]   ;;  %v3534_v56 = vld [vmem:[%s4863_s2 + $0x210] ss:$8 sps:$4 sm:$0xff]  }
  0x40   : > { %915 = vmatprep.subr.bf16.mxu0 %v3448_v55  ;;  %693 = vmatprep.subr.bf16.mxu1 %v3480_v57  ;;  %v3539_v55 = vld [vmem:[%s4863_s2 + $0x314] ss:$8 sps:$4 sm:$0xff]   ;;  %v3537_v57 = vld [vmem:[%s4863_s2 + $0x310] ss:$8 sps:$4 sm:$0xff]  }
  0x43   : > { %916 = vmatpush1.bf16.msra.mxu0 %v3446_v58  ;;  %694 = vmatpush2.bf16.msra.mxu1 %v3485_v60  ;;  %v3542_v58 = vld [vmem:[%s4863_s2 + $0x204] ss:$8 sps:$4 sm:$0xff]   ;;  %v3540_v60 = vld [vmem:[%s4863_s2 + $0x200] ss:$8 sps:$4 sm:$0xff]  }
  0x44   : > { %917 = vmatprep.subr.bf16.mxu0 %v3454_v59  ;;  %695 = vmatprep.subr.bf16.mxu1 %v3486_v9  ;;  %v3545_v59 = vld [vmem:[%s4863_s2 + $0x304] ss:$8 sps:$4 sm:$0xff]   ;;  %v3558_v9 = vld [vmem:[%s4863_s2 + $0x2d0] ss:$8 sps:$4 sm:$0xff]  }
  0x47   : > { %918 = vmatpush2.bf16.msra.mxu0 %v3452_v61  ;;  %696 = vmatpush2.bf16.msra.mxu1 %v3491_v12  ;;  %v3543_v61 = vld [vmem:[%s4863_s2 + $0x300] ss:$8 sps:$4 sm:$0xff]   ;;  %v3569_v12 = vld [vmem:[%s4863_s2 + $0x3c4] ss:$8 sps:$4 sm:$0xff]  }
  0x48   : > { %919 = vmatprep.subr.bf16.mxu0 %v3460_v62  ;;  %697 = vmatprep.subr.bf16.mxu1 %v3492_v13  ;;  %v3548_v62 = vld [vmem:[%s4863_s2 + $0x2f4] ss:$8 sps:$4 sm:$0xff]   ;;  %v3564_v13 = vld [vmem:[%s4863_s2 + $0x2c0] ss:$8 sps:$4 sm:$0xff]  }
  0x4b   : > { %920 = vmatpush2.bf16.msra.mxu0 %v3458_v63  ;;  %698 = vmatpush2.bf16.msra.mxu1 %v3497_v16  ;;  %v3551_v63 = vld [vmem:[%s4863_s2 + $0x3f4] ss:$8 sps:$4 sm:$0xff]  }
  0x4c   : > { %921 = vmatprep.subr.bf16.mxu0 %v3466_v1  ;;  %1135 = vmatprep.subr.bf16.mxu1 %v3500_v17  ;;  %v3546_v1 = vld [vmem:[%s4863_s2 + $0x2f0] ss:$8 sps:$4 sm:$0xff]   ;;  %v3575_v16 = vld [vmem:[%s4863_s2 + $0x3b4] ss:$8 sps:$4 sm:$0xff]  }
  0x4d   : > { %v3570_v17 = vld [vmem:[%s4863_s2 + $0x2b0] ss:$8 sps:$4 sm:$0xff]  }
  0x4f   : > { %922 = vmatpush2.bf16.msra.mxu0 %v3464_v2  ;;  %v3549_v2 = vld [vmem:[%s4863_s2 + $0x3f0] ss:$8 sps:$4 sm:$0xff]  }
  0x50   : > { %923 = vmatprep.subr.bf16.mxu0 %v3472_v3  ;;  %v3554_v3 = vld [vmem:[%s4863_s2 + $0x2e4] ss:$8 sps:$4 sm:$0xff]  }
  0x53   : > { %924 = vmatpush2.bf16.msra.mxu0 %v3470_v4  ;;  %v3557_v4 = vld [vmem:[%s4863_s2 + $0x3e4] ss:$8 sps:$4 sm:$0xff]  }
  0x54   : > { %925 = vmatprep.subr.bf16.mxu0 %v3478_v5  ;;  %v3552_v5 = vld [vmem:[%s4863_s2 + $0x2e0] ss:$8 sps:$4 sm:$0xff]  }
  0x57   : > { %926 = vmatpush2.bf16.msra.mxu0 %v3476_v6  ;;  %v3555_v6 = vld [vmem:[%s4863_s2 + $0x3e0] ss:$8 sps:$4 sm:$0xff]  }
  0x58   : > { %927 = vmatprep.subr.bf16.mxu0 %v3484_v7  ;;  %v3560_v7 = vld [vmem:[%s4863_s2 + $0x2d4] ss:$8 sps:$4 sm:$0xff]  }
  0x5b   : > { %928 = vmatpush2.bf16.msra.mxu0 %v3482_v8  ;;  %v3563_v8 = vld [vmem:[%s4863_s2 + $0x3d4] ss:$8 sps:$4 sm:$0xff]  }
  0x5c   : > { %929 = vmatprep.subr.bf16.mxu0 %v3490_v10  ;;  %v3561_v10 = vld [vmem:[%s4863_s2 + $0x3d0] ss:$8 sps:$4 sm:$0xff]  }
  0x5f   : > { %930 = vmatpush2.bf16.msra.mxu0 %v3488_v11  ;;  %v3566_v11 = vld [vmem:[%s4863_s2 + $0x2c4] ss:$8 sps:$4 sm:$0xff]  }
  0x60   : > { %931 = vmatprep.subr.bf16.mxu0 %v3496_v14  ;;  %v3567_v14 = vld [vmem:[%s4863_s2 + $0x3c0] ss:$8 sps:$4 sm:$0xff]  }
  0x63   : > { %932 = vmatpush2.bf16.msra.mxu0 %v3494_v15  ;;  %v3572_v15 = vld [vmem:[%s4863_s2 + $0x2b4] ss:$8 sps:$4 sm:$0xff]  }
  0x64   : > { %1369 = vmatprep.subr.bf16.mxu0 %v3503_v18  ;;  %v3573_v18 = vld [vmem:[%s4863_s2 + $0x3b0] ss:$8 sps:$4 sm:$0xff]  }
  0x88   : > { %v368_v19 = vpop.permute.xlu0 %367 }
  0xe6   : > { %v460_v20 = vpop.f32.mrf.mxu0 }
  0xe7   : > { %v461_v21 = vadd.f32 %v460_v20, %v368_v19  ;;  %v3581_v20 = vld [vmem:[%s4863_s2 + $0x3a4] ss:$8 sps:$4 sm:$0xff]  }
  0xe8   : > { %v462_v22 = vpop.f32.mrf.mxu0 }
  0xe9   : > { %vm467_vm2 = vcmp.ge.f32.partialorder %v461_v21, 0.0  ;;  %v469_v23 = vmul.f32 0.2, %v461_v21  ;;  %v463_v24 = vadd.f32 %v462_v22, %v368_v19  ;;  %v3578_v19 = vld [vmem:[%s4863_s2 + $0x2a4] ss:$8 sps:$4 sm:$0xff]  }
  0xea   : > { %v464_v25 = vpop.f32.mrf.mxu0  ;;  %v3579_v22 = vld [vmem:[%s4863_s2 + $0x3a0] ss:$8 sps:$4 sm:$0xff]  }
  0xeb   : > { %vm468_vm3 = vcmp.ge.f32.partialorder %v463_v24, 0.0  ;;  %v470_v26 = vmul.f32 0.2, %v463_v24  ;;  %v471_v27 = vsel %vm467_vm2, %v461_v21, %v469_v23  ;;  %v3576_v21 = vld [vmem:[%s4863_s2 + $0x2a0] ss:$8 sps:$4 sm:$0xff]  }
  0xec   : > { %v465_v28 = vpop.f32.mrf.mxu0  ;;  %v4140_v33 = vpack.c.bf16 %v471_v27, %v471_v27  ;;  %v3584_v23 = vld [vmem:[%s4863_s2 + $0x294] ss:$8 sps:$4 sm:$0xff]   ;;  %v3582_v25 = vld [vmem:[%s4863_s2 + $0x290] ss:$8 sps:$4 sm:$0xff]   ;;  %v3590_v27 = vld [vmem:[%s4863_s2 + $0x284] ss:$8 sps:$4 sm:$0xff]  }
  0xed   : > { %v472_v29 = vsel %vm468_vm3, %v463_v24, %v470_v26  ;;  %v3587_v24 = vld [vmem:[%s4863_s2 + $0x394] ss:$8 sps:$4 sm:$0xff]   ;;  %v3585_v26 = vld [vmem:[%s4863_s2 + $0x390] ss:$8 sps:$4 sm:$0xff]   ;;  %v3593_v28 = vld [vmem:[%s4863_s2 + $0x384] ss:$8 sps:$4 sm:$0xff]  }
  0xee   : > { %v4132_v30 = vpack.c.bf16 %v472_v29, %v472_v29  ;;  %v3588_v29 = vld [vmem:[%s4863_s2 + $0x280] ss:$8 sps:$4 sm:$0xff]  }
  0xf0   : > { %699 = vmatprep.mubr.bf16.mxu1 %v4132_v30  ;;  %933 = vmatprep.mubr.bf16.mxu0 %v4132_v30 }
  0xf1   : > { %700 = vmatmul.mubr.bf16.vlgmr.msra.gmra.mxu1 %v4140_v33  ;;  %934 = vmatmul.mubr.bf16.vlgmr.msra.gmra.mxu0 %v4140_v33 }
  0xf2   : > { %1136 = vmatpush1.bf16.msra.mxu1 %v3498_v31  ;;  %1370 = vmatpush1.bf16.msra.mxu0 %v3501_v32  ;;  %v3591_v31 = vld [vmem:[%s4863_s2 + $0x380] ss:$8 sps:$4 sm:$0xff]   ;;  %v3596_v32 = vld [vmem:[%s4863_s2 + $0x474] ss:$8 sps:$4 sm:$0xff]  }
  0xf3   : > { %1167 = vmatprep.mubr.bf16.mxu1 %v4132_v30  ;;  %1401 = vmatprep.mubr.bf16.mxu0 %v4132_v30 }
  0xf4   : > { %1137 = vmatprep.subr.bf16.mxu1 %v3506_v34  ;;  %1371 = vmatprep.subr.bf16.mxu0 %v3509_v35  ;;  %v3599_v34 = vld [vmem:[%s4863_s2 + $0x574] ss:$8 sps:$4 sm:$0xff]   ;;  %v3594_v35 = vld [vmem:[%s4863_s2 + $0x470] ss:$8 sps:$4 sm:$0xff]  }
  0xf6   : > { %1138 = vmatpush1.bf16.msra.mxu1 %v3504_v36  ;;  %1372 = vmatpush1.bf16.msra.mxu0 %v3507_v37  ;;  %v3597_v36 = vld [vmem:[%s4863_s2 + $0x570] ss:$8 sps:$4 sm:$0xff]   ;;  %v3602_v37 = vld [vmem:[%s4863_s2 + $0x464] ss:$8 sps:$4 sm:$0xff]  }
  0xf7   : > { %1139 = vmatprep.subr.bf16.mxu1 %v3512_v38  ;;  %1373 = vmatprep.subr.bf16.mxu0 %v3515_v39  ;;  %v3605_v38 = vld [vmem:[%s4863_s2 + $0x564] ss:$8 sps:$4 sm:$0xff]   ;;  %v3600_v39 = vld [vmem:[%s4863_s2 + $0x460] ss:$8 sps:$4 sm:$0xff]  }
  0xfa   : > { %1140 = vmatpush1.bf16.msra.mxu1 %v3510_v40  ;;  %1374 = vmatpush1.bf16.msra.mxu0 %v3513_v41  ;;  %v3603_v40 = vld [vmem:[%s4863_s2 + $0x560] ss:$8 sps:$4 sm:$0xff]   ;;  %v3608_v41 = vld [vmem:[%s4863_s2 + $0x454] ss:$8 sps:$4 sm:$0xff]  }
  0xfb   : > { %1141 = vmatprep.subr.bf16.mxu1 %v3518_v42  ;;  %1375 = vmatprep.subr.bf16.mxu0 %v3521_v43  ;;  %v3611_v42 = vld [vmem:[%s4863_s2 + $0x554] ss:$8 sps:$4 sm:$0xff]   ;;  %v3606_v43 = vld [vmem:[%s4863_s2 + $0x450] ss:$8 sps:$4 sm:$0xff]  }
  0xfe   : > { %1142 = vmatpush1.bf16.msra.mxu1 %v3516_v44  ;;  %1376 = vmatpush1.bf16.msra.mxu0 %v3519_v45  ;;  %v3609_v44 = vld [vmem:[%s4863_s2 + $0x550] ss:$8 sps:$4 sm:$0xff]   ;;  %v3614_v45 = vld [vmem:[%s4863_s2 + $0x444] ss:$8 sps:$4 sm:$0xff]  }
  0xff   : > { %1143 = vmatprep.subr.bf16.mxu1 %v3524_v46  ;;  %1377 = vmatprep.subr.bf16.mxu0 %v3527_v47  ;;  %v3617_v46 = vld [vmem:[%s4863_s2 + $0x544] ss:$8 sps:$4 sm:$0xff]   ;;  %v3612_v47 = vld [vmem:[%s4863_s2 + $0x440] ss:$8 sps:$4 sm:$0xff]  }
 0x102   : > { %1144 = vmatpush1.bf16.msra.mxu1 %v3522_v48  ;;  %1378 = vmatpush1.bf16.msra.mxu0 %v3525_v49  ;;  %v3615_v48 = vld [vmem:[%s4863_s2 + $0x540] ss:$8 sps:$4 sm:$0xff]   ;;  %v3620_v49 = vld [vmem:[%s4863_s2 + $0x434] ss:$8 sps:$4 sm:$0xff]  }
 0x103   : > { %1145 = vmatprep.subr.bf16.mxu1 %v3530_v50  ;;  %1379 = vmatprep.subr.bf16.mxu0 %v3533_v51  ;;  %v3623_v50 = vld [vmem:[%s4863_s2 + $0x534] ss:$8 sps:$4 sm:$0xff]   ;;  %v3618_v51 = vld [vmem:[%s4863_s2 + $0x430] ss:$8 sps:$4 sm:$0xff]  }
 0x106   : > { %1146 = vmatpush1.bf16.msra.mxu1 %v3528_v52  ;;  %1380 = vmatpush1.bf16.msra.mxu0 %v3531_v53  ;;  %v3621_v52 = vld [vmem:[%s4863_s2 + $0x530] ss:$8 sps:$4 sm:$0xff]   ;;  %v3626_v53 = vld [vmem:[%s4863_s2 + $0x424] ss:$8 sps:$4 sm:$0xff]  }
 0x107   : > { %1147 = vmatprep.subr.bf16.mxu1 %v3536_v54  ;;  %1381 = vmatprep.subr.bf16.mxu0 %v3539_v55  ;;  %v3629_v54 = vld [vmem:[%s4863_s2 + $0x524] ss:$8 sps:$4 sm:$0xff]   ;;  %v3624_v55 = vld [vmem:[%s4863_s2 + $0x420] ss:$8 sps:$4 sm:$0xff]  }
 0x10a   : > { %1148 = vmatpush1.bf16.msra.mxu1 %v3534_v56  ;;  %1382 = vmatpush1.bf16.msra.mxu0 %v3537_v57  ;;  %v3627_v56 = vld [vmem:[%s4863_s2 + $0x520] ss:$8 sps:$4 sm:$0xff]   ;;  %v3632_v57 = vld [vmem:[%s4863_s2 + $0x414] ss:$8 sps:$4 sm:$0xff]  }
 0x10b   : > { %1149 = vmatprep.subr.bf16.mxu1 %v3542_v58  ;;  %1383 = vmatprep.subr.bf16.mxu0 %v3545_v59  ;;  %v3635_v58 = vld [vmem:[%s4863_s2 + $0x514] ss:$8 sps:$4 sm:$0xff]   ;;  %v3630_v59 = vld [vmem:[%s4863_s2 + $0x410] ss:$8 sps:$4 sm:$0xff]  }
 0x10e   : > { %1150 = vmatpush1.bf16.msra.mxu1 %v3540_v60  ;;  %1384 = vmatpush1.bf16.msra.mxu0 %v3543_v61  ;;  %v3633_v60 = vld [vmem:[%s4863_s2 + $0x510] ss:$8 sps:$4 sm:$0xff]   ;;  %v3638_v61 = vld [vmem:[%s4863_s2 + $0x404] ss:$8 sps:$4 sm:$0xff]  }
 0x10f   : > { %1151 = vmatprep.subr.bf16.mxu1 %v3548_v62  ;;  %1385 = vmatprep.subr.bf16.mxu0 %v3551_v63  ;;  %v3641_v62 = vld [vmem:[%s4863_s2 + $0x504] ss:$8 sps:$4 sm:$0xff]   ;;  %v3636_v63 = vld [vmem:[%s4863_s2 + $0x400] ss:$8 sps:$4 sm:$0xff]  }
 0x112   : > { %1152 = vmatpush2.bf16.msra.mxu1 %v3546_v1  ;;  %1386 = vmatpush2.bf16.msra.mxu0 %v3549_v2  ;;  %v3639_v1 = vld [vmem:[%s4863_s2 + $0x500] ss:$8 sps:$4 sm:$0xff]   ;;  %v3644_v2 = vld [vmem:[%s4863_s2 + $0x4f4] ss:$8 sps:$4 sm:$0xff]  }
 0x113   : > { %1153 = vmatprep.subr.bf16.mxu1 %v3554_v3  ;;  %1387 = vmatprep.subr.bf16.mxu0 %v3557_v4  ;;  %v3647_v3 = vld [vmem:[%s4863_s2 + $0x5f4] ss:$8 sps:$4 sm:$0xff]   ;;  %v3642_v4 = vld [vmem:[%s4863_s2 + $0x4f0] ss:$8 sps:$4 sm:$0xff]  }
 0x116   : > { %1154 = vmatpush2.bf16.msra.mxu1 %v3552_v5  ;;  %1388 = vmatpush2.bf16.msra.mxu0 %v3555_v6  ;;  %v3645_v5 = vld [vmem:[%s4863_s2 + $0x5f0] ss:$8 sps:$4 sm:$0xff]   ;;  %v3650_v6 = vld [vmem:[%s4863_s2 + $0x4e4] ss:$8 sps:$4 sm:$0xff]  }
 0x117   : > { %1155 = vmatprep.subr.bf16.mxu1 %v3560_v7  ;;  %1389 = vmatprep.subr.bf16.mxu0 %v3563_v8  ;;  %v3653_v7 = vld [vmem:[%s4863_s2 + $0x5e4] ss:$8 sps:$4 sm:$0xff]   ;;  %v3648_v8 = vld [vmem:[%s4863_s2 + $0x4e0] ss:$8 sps:$4 sm:$0xff]  }
 0x11a   : > { %1156 = vmatpush2.bf16.msra.mxu1 %v3558_v9  ;;  %1390 = vmatpush2.bf16.msra.mxu0 %v3561_v10  ;;  %v3651_v9 = vld [vmem:[%s4863_s2 + $0x5e0] ss:$8 sps:$4 sm:$0xff]   ;;  %v3656_v10 = vld [vmem:[%s4863_s2 + $0x4d4] ss:$8 sps:$4 sm:$0xff]  }
 0x11b   : > { %1157 = vmatprep.subr.bf16.mxu1 %v3566_v11  ;;  %1391 = vmatprep.subr.bf16.mxu0 %v3569_v12  ;;  %v3659_v11 = vld [vmem:[%s4863_s2 + $0x5d4] ss:$8 sps:$4 sm:$0xff]   ;;  %v3654_v12 = vld [vmem:[%s4863_s2 + $0x4d0] ss:$8 sps:$4 sm:$0xff]  }
 0x11e   : > { %1158 = vmatpush2.bf16.msra.mxu1 %v3564_v13  ;;  %1392 = vmatpush2.bf16.msra.mxu0 %v3567_v14  ;;  %v3657_v13 = vld [vmem:[%s4863_s2 + $0x5d0] ss:$8 sps:$4 sm:$0xff]   ;;  %v3662_v14 = vld [vmem:[%s4863_s2 + $0x4c4] ss:$8 sps:$4 sm:$0xff]  }
 0x11f   : > { %1159 = vmatprep.subr.bf16.mxu1 %v3572_v15  ;;  %1393 = vmatprep.subr.bf16.mxu0 %v3575_v16  ;;  %v3665_v15 = vld [vmem:[%s4863_s2 + $0x5c4] ss:$8 sps:$4 sm:$0xff]   ;;  %v3660_v16 = vld [vmem:[%s4863_s2 + $0x4c0] ss:$8 sps:$4 sm:$0xff]  }
 0x122   : > { %1160 = vmatpush2.bf16.msra.mxu1 %v3570_v17  ;;  %1394 = vmatpush2.bf16.msra.mxu0 %v3573_v18  ;;  %v3663_v17 = vld [vmem:[%s4863_s2 + $0x5c0] ss:$8 sps:$4 sm:$0xff]   ;;  %v3668_v18 = vld [vmem:[%s4863_s2 + $0x4b4] ss:$8 sps:$4 sm:$0xff]  }
 0x123   : > { %1161 = vmatprep.subr.bf16.mxu1 %v3578_v19  ;;  %1395 = vmatprep.subr.bf16.mxu0 %v3581_v20  ;;  %v3671_v19 = vld [vmem:[%s4863_s2 + $0x5b4] ss:$8 sps:$4 sm:$0xff]   ;;  %v3666_v20 = vld [vmem:[%s4863_s2 + $0x4b0] ss:$8 sps:$4 sm:$0xff]  }
 0x126   : > { %1162 = vmatpush2.bf16.msra.mxu1 %v3576_v21  ;;  %1396 = vmatpush2.bf16.msra.mxu0 %v3579_v22  ;;  %v3669_v21 = vld [vmem:[%s4863_s2 + $0x5b0] ss:$8 sps:$4 sm:$0xff]   ;;  %v3674_v22 = vld [vmem:[%s4863_s2 + $0x4a4] ss:$8 sps:$4 sm:$0xff]  }
 0x127   : > { %1163 = vmatprep.subr.bf16.mxu1 %v3584_v23  ;;  %1397 = vmatprep.subr.bf16.mxu0 %v3587_v24  ;;  %v3677_v23 = vld [vmem:[%s4863_s2 + $0x5a4] ss:$8 sps:$4 sm:$0xff]   ;;  %v3672_v24 = vld [vmem:[%s4863_s2 + $0x4a0] ss:$8 sps:$4 sm:$0xff]  }
 0x12a   : > { %1164 = vmatpush2.bf16.msra.mxu1 %v3582_v25  ;;  %1398 = vmatpush2.bf16.msra.mxu0 %v3585_v26  ;;  %v3675_v25 = vld [vmem:[%s4863_s2 + $0x5a0] ss:$8 sps:$4 sm:$0xff]   ;;  %v3680_v26 = vld [vmem:[%s4863_s2 + $0x494] ss:$8 sps:$4 sm:$0xff]  }
 0x12b   : > { %1165 = vmatprep.subr.bf16.mxu1 %v3590_v27  ;;  %1399 = vmatprep.subr.bf16.mxu0 %v3593_v28  ;;  %v3683_v27 = vld [vmem:[%s4863_s2 + $0x594] ss:$8 sps:$4 sm:$0xff]   ;;  %v3678_v28 = vld [vmem:[%s4863_s2 + $0x490] ss:$8 sps:$4 sm:$0xff]  }
 0x12e   : > { %1166 = vmatpush2.bf16.msra.mxu1 %v3588_v29  ;;  %1400 = vmatpush2.bf16.msra.mxu0 %v3591_v31  ;;  %v3681_v29 = vld [vmem:[%s4863_s2 + $0x590] ss:$8 sps:$4 sm:$0xff]   ;;  %v3686_v31 = vld [vmem:[%s4863_s2 + $0x484] ss:$8 sps:$4 sm:$0xff]  }
 0x12f   : > { %1603 = vmatprep.subr.bf16.mxu1 %v3596_v32  ;;  %1837 = vmatprep.subr.bf16.mxu0 %v3599_v34  ;;  %v3689_v32 = vld [vmem:[%s4863_s2 + $0x584] ss:$8 sps:$4 sm:$0xff]   ;;  %v3684_v34 = vld [vmem:[%s4863_s2 + $0x480] ss:$8 sps:$4 sm:$0xff]  }
 0x131   : > { %1168 = vmatmul.mubr.bf16.vlgmr.msra.gmra.mxu1 %v4140_v33  ;;  %1402 = vmatmul.mubr.bf16.vlgmr.msra.gmra.mxu0 %v4140_v33 }
 0x132   : > { %1604 = vmatpush1.bf16.msra.mxu1 %v3594_v35  ;;  %1635 = vmatprep.mubr.bf16.mxu1 %v4132_v30  ;;  %v3687_v35 = vld [vmem:[%s4863_s2 + $0x580] ss:$8 sps:$4 sm:$0xff]  }
 0x133   : > { %1838 = vmatpush1.bf16.msra.mxu0 %v3597_v36  ;;  %1869 = vmatprep.mubr.bf16.mxu0 %v4132_v30  ;;  %v3692_v36 = vld [vmem:[%s4863_s2 + $0x674] ss:$8 sps:$4 sm:$0xff]  }
 0x134   : > { %1605 = vmatprep.subr.bf16.mxu1 %v3602_v37  ;;  %1839 = vmatprep.subr.bf16.mxu0 %v3605_v38  ;;  %v3695_v37 = vld [vmem:[%s4863_s2 + $0x774] ss:$8 sps:$4 sm:$0xff]   ;;  %v3690_v38 = vld [vmem:[%s4863_s2 + $0x670] ss:$8 sps:$4 sm:$0xff]  }
 0x136   : > { %1606 = vmatpush1.bf16.msra.mxu1 %v3600_v39  ;;  %v3693_v39 = vld [vmem:[%s4863_s2 + $0x770] ss:$8 sps:$4 sm:$0xff]  }
 0x137   : > { %1840 = vmatpush1.bf16.msra.mxu0 %v3603_v40  ;;  %1607 = vmatprep.subr.bf16.mxu1 %v3608_v41  ;;  %v3698_v40 = vld [vmem:[%s4863_s2 + $0x664] ss:$8 sps:$4 sm:$0xff]  }
 0x138   : > { %1841 = vmatprep.subr.bf16.mxu0 %v3611_v42  ;;  %v3701_v41 = vld [vmem:[%s4863_s2 + $0x764] ss:$8 sps:$4 sm:$0xff]   ;;  %v3696_v42 = vld [vmem:[%s4863_s2 + $0x660] ss:$8 sps:$4 sm:$0xff]  }
 0x13a   : > { %1608 = vmatpush1.bf16.msra.mxu1 %v3606_v43  ;;  %v3699_v43 = vld [vmem:[%s4863_s2 + $0x760] ss:$8 sps:$4 sm:$0xff]  }
 0x13b   : > { %1842 = vmatpush1.bf16.msra.mxu0 %v3609_v44  ;;  %1609 = vmatprep.subr.bf16.mxu1 %v3614_v45  ;;  %v3704_v44 = vld [vmem:[%s4863_s2 + $0x654] ss:$8 sps:$4 sm:$0xff]  }
 0x13c   : > { %1843 = vmatprep.subr.bf16.mxu0 %v3617_v46  ;;  %v3707_v45 = vld [vmem:[%s4863_s2 + $0x754] ss:$8 sps:$4 sm:$0xff]   ;;  %v3702_v46 = vld [vmem:[%s4863_s2 + $0x650] ss:$8 sps:$4 sm:$0xff]  }
 0x13e   : > { %1610 = vmatpush1.bf16.msra.mxu1 %v3612_v47  ;;  %v3705_v47 = vld [vmem:[%s4863_s2 + $0x750] ss:$8 sps:$4 sm:$0xff]  }
 0x13f   : > { %1844 = vmatpush1.bf16.msra.mxu0 %v3615_v48  ;;  %1611 = vmatprep.subr.bf16.mxu1 %v3620_v49  ;;  %v3710_v48 = vld [vmem:[%s4863_s2 + $0x644] ss:$8 sps:$4 sm:$0xff]  }
 0x140   : > { %1845 = vmatprep.subr.bf16.mxu0 %v3623_v50  ;;  %v3713_v49 = vld [vmem:[%s4863_s2 + $0x744] ss:$8 sps:$4 sm:$0xff]   ;;  %v3708_v50 = vld [vmem:[%s4863_s2 + $0x640] ss:$8 sps:$4 sm:$0xff]  }
 0x142   : > { %1612 = vmatpush1.bf16.msra.mxu1 %v3618_v51  ;;  %v3711_v51 = vld [vmem:[%s4863_s2 + $0x740] ss:$8 sps:$4 sm:$0xff]  }
 0x143   : > { %1846 = vmatpush1.bf16.msra.mxu0 %v3621_v52  ;;  %1613 = vmatprep.subr.bf16.mxu1 %v3626_v53  ;;  %v3716_v52 = vld [vmem:[%s4863_s2 + $0x634] ss:$8 sps:$4 sm:$0xff]  }
 0x144   : > { %1847 = vmatprep.subr.bf16.mxu0 %v3629_v54  ;;  %v3719_v53 = vld [vmem:[%s4863_s2 + $0x734] ss:$8 sps:$4 sm:$0xff]   ;;  %v3714_v54 = vld [vmem:[%s4863_s2 + $0x630] ss:$8 sps:$4 sm:$0xff]  }
 0x146   : > { %1614 = vmatpush1.bf16.msra.mxu1 %v3624_v55  ;;  %v3717_v55 = vld [vmem:[%s4863_s2 + $0x730] ss:$8 sps:$4 sm:$0xff]  }
 0x147   : > { %1848 = vmatpush1.bf16.msra.mxu0 %v3627_v56  ;;  %1615 = vmatprep.subr.bf16.mxu1 %v3632_v57  ;;  %v3722_v56 = vld [vmem:[%s4863_s2 + $0x624] ss:$8 sps:$4 sm:$0xff]  }
 0x148   : > { %1849 = vmatprep.subr.bf16.mxu0 %v3635_v58  ;;  %v3725_v57 = vld [vmem:[%s4863_s2 + $0x724] ss:$8 sps:$4 sm:$0xff]   ;;  %v3720_v58 = vld [vmem:[%s4863_s2 + $0x620] ss:$8 sps:$4 sm:$0xff]  }
 0x14a   : > { %1616 = vmatpush1.bf16.msra.mxu1 %v3630_v59  ;;  %v3723_v59 = vld [vmem:[%s4863_s2 + $0x720] ss:$8 sps:$4 sm:$0xff]  }
 0x14b   : > { %1850 = vmatpush1.bf16.msra.mxu0 %v3633_v60  ;;  %1617 = vmatprep.subr.bf16.mxu1 %v3638_v61  ;;  %v3728_v60 = vld [vmem:[%s4863_s2 + $0x614] ss:$8 sps:$4 sm:$0xff]  }
 0x14c   : > { %1851 = vmatprep.subr.bf16.mxu0 %v3641_v62  ;;  %v3731_v61 = vld [vmem:[%s4863_s2 + $0x714] ss:$8 sps:$4 sm:$0xff]   ;;  %v3726_v62 = vld [vmem:[%s4863_s2 + $0x610] ss:$8 sps:$4 sm:$0xff]  }
 0x14e   : > { %1618 = vmatpush1.bf16.msra.mxu1 %v3636_v63  ;;  %v3729_v63 = vld [vmem:[%s4863_s2 + $0x710] ss:$8 sps:$4 sm:$0xff]  }
 0x14f   : > { %1852 = vmatpush1.bf16.msra.mxu0 %v3639_v1  ;;  %1619 = vmatprep.subr.bf16.mxu1 %v3644_v2  ;;  %v3734_v1 = vld [vmem:[%s4863_s2 + $0x604] ss:$8 sps:$4 sm:$0xff]  }
 0x150   : > { %1853 = vmatprep.subr.bf16.mxu0 %v3647_v3  ;;  %v3737_v2 = vld [vmem:[%s4863_s2 + $0x704] ss:$8 sps:$4 sm:$0xff]   ;;  %v3732_v3 = vld [vmem:[%s4863_s2 + $0x600] ss:$8 sps:$4 sm:$0xff]  }
 0x152   : > { %1620 = vmatpush2.bf16.msra.mxu1 %v3642_v4  ;;  %v3735_v4 = vld [vmem:[%s4863_s2 + $0x700] ss:$8 sps:$4 sm:$0xff]  }
 0x153   : > { %1854 = vmatpush2.bf16.msra.mxu0 %v3645_v5  ;;  %1621 = vmatprep.subr.bf16.mxu1 %v3650_v6  ;;  %v3740_v5 = vld [vmem:[%s4863_s2 + $0x6f4] ss:$8 sps:$4 sm:$0xff]  }
 0x154   : > { %1855 = vmatprep.subr.bf16.mxu0 %v3653_v7  ;;  %v3743_v6 = vld [vmem:[%s4863_s2 + $0x7f4] ss:$8 sps:$4 sm:$0xff]   ;;  %v3738_v7 = vld [vmem:[%s4863_s2 + $0x6f0] ss:$8 sps:$4 sm:$0xff]  }
 0x156   : > { %1622 = vmatpush2.bf16.msra.mxu1 %v3648_v8  ;;  %v3741_v8 = vld [vmem:[%s4863_s2 + $0x7f0] ss:$8 sps:$4 sm:$0xff]  }
 0x157   : > { %1856 = vmatpush2.bf16.msra.mxu0 %v3651_v9  ;;  %1623 = vmatprep.subr.bf16.mxu1 %v3656_v10  ;;  %v3746_v9 = vld [vmem:[%s4863_s2 + $0x6e4] ss:$8 sps:$4 sm:$0xff]  }
 0x158   : > { %1857 = vmatprep.subr.bf16.mxu0 %v3659_v11  ;;  %v3749_v10 = vld [vmem:[%s4863_s2 + $0x7e4] ss:$8 sps:$4 sm:$0xff]   ;;  %v3744_v11 = vld [vmem:[%s4863_s2 + $0x6e0] ss:$8 sps:$4 sm:$0xff]  }
 0x15a   : > { %1624 = vmatpush2.bf16.msra.mxu1 %v3654_v12  ;;  %v3747_v12 = vld [vmem:[%s4863_s2 + $0x7e0] ss:$8 sps:$4 sm:$0xff]  }
 0x15b   : > { %1858 = vmatpush2.bf16.msra.mxu0 %v3657_v13  ;;  %1625 = vmatprep.subr.bf16.mxu1 %v3662_v14  ;;  %v3752_v13 = vld [vmem:[%s4863_s2 + $0x6d4] ss:$8 sps:$4 sm:$0xff]  }
 0x15c   : > { %1859 = vmatprep.subr.bf16.mxu0 %v3665_v15  ;;  %v3755_v14 = vld [vmem:[%s4863_s2 + $0x7d4] ss:$8 sps:$4 sm:$0xff]   ;;  %v3750_v15 = vld [vmem:[%s4863_s2 + $0x6d0] ss:$8 sps:$4 sm:$0xff]  }
 0x15e   : > { %1626 = vmatpush2.bf16.msra.mxu1 %v3660_v16  ;;  %v3753_v16 = vld [vmem:[%s4863_s2 + $0x7d0] ss:$8 sps:$4 sm:$0xff]  }
 0x15f   : > { %1860 = vmatpush2.bf16.msra.mxu0 %v3663_v17  ;;  %1627 = vmatprep.subr.bf16.mxu1 %v3668_v18  ;;  %v3758_v17 = vld [vmem:[%s4863_s2 + $0x6c4] ss:$8 sps:$4 sm:$0xff]  }
 0x160   : > { %1861 = vmatprep.subr.bf16.mxu0 %v3671_v19  ;;  %v3761_v18 = vld [vmem:[%s4863_s2 + $0x7c4] ss:$8 sps:$4 sm:$0xff]   ;;  %v3756_v19 = vld [vmem:[%s4863_s2 + $0x6c0] ss:$8 sps:$4 sm:$0xff]  }
 0x162   : > { %1628 = vmatpush2.bf16.msra.mxu1 %v3666_v20  ;;  %v3759_v20 = vld [vmem:[%s4863_s2 + $0x7c0] ss:$8 sps:$4 sm:$0xff]  }
 0x163   : > { %1862 = vmatpush2.bf16.msra.mxu0 %v3669_v21  ;;  %1629 = vmatprep.subr.bf16.mxu1 %v3674_v22  ;;  %v3764_v21 = vld [vmem:[%s4863_s2 + $0x6b4] ss:$8 sps:$4 sm:$0xff]  }
 0x164   : > { %1863 = vmatprep.subr.bf16.mxu0 %v3677_v23  ;;  %v3767_v22 = vld [vmem:[%s4863_s2 + $0x7b4] ss:$8 sps:$4 sm:$0xff]   ;;  %v3762_v23 = vld [vmem:[%s4863_s2 + $0x6b0] ss:$8 sps:$4 sm:$0xff]  }
 0x166   : > { %1630 = vmatpush2.bf16.msra.mxu1 %v3672_v24  ;;  %v3765_v24 = vld [vmem:[%s4863_s2 + $0x7b0] ss:$8 sps:$4 sm:$0xff]  }
 0x167   : > { %1864 = vmatpush2.bf16.msra.mxu0 %v3675_v25  ;;  %1631 = vmatprep.subr.bf16.mxu1 %v3680_v26  ;;  %v3770_v25 = vld [vmem:[%s4863_s2 + $0x6a4] ss:$8 sps:$4 sm:$0xff]  }
 0x168   : > { %1865 = vmatprep.subr.bf16.mxu0 %v3683_v27  ;;  %v3773_v26 = vld [vmem:[%s4863_s2 + $0x7a4] ss:$8 sps:$4 sm:$0xff]   ;;  %v3768_v27 = vld [vmem:[%s4863_s2 + $0x6a0] ss:$8 sps:$4 sm:$0xff]  }
 0x16a   : > { %1632 = vmatpush2.bf16.msra.mxu1 %v3678_v28  ;;  %v3771_v28 = vld [vmem:[%s4863_s2 + $0x7a0] ss:$8 sps:$4 sm:$0xff]  }
 0x16b   : > { %1866 = vmatpush2.bf16.msra.mxu0 %v3681_v29  ;;  %1633 = vmatprep.subr.bf16.mxu1 %v3686_v31  ;;  %v3776_v29 = vld [vmem:[%s4863_s2 + $0x694] ss:$8 sps:$4 sm:$0xff]  }
 0x16c   : > { %1867 = vmatprep.subr.bf16.mxu0 %v3689_v32  ;;  %v3779_v31 = vld [vmem:[%s4863_s2 + $0x794] ss:$8 sps:$4 sm:$0xff]   ;;  %v3774_v32 = vld [vmem:[%s4863_s2 + $0x690] ss:$8 sps:$4 sm:$0xff]  }
 0x16e   : > { %1634 = vmatpush2.bf16.msra.mxu1 %v3684_v34  ;;  %v3777_v34 = vld [vmem:[%s4863_s2 + $0x790] ss:$8 sps:$4 sm:$0xff]  }
 0x16f   : > { %1868 = vmatpush2.bf16.msra.mxu0 %v3687_v35  ;;  %2071 = vmatprep.subr.bf16.mxu1 %v3692_v36  ;;  %v3782_v35 = vld [vmem:[%s4863_s2 + $0x684] ss:$8 sps:$4 sm:$0xff]  }
 0x170   : > { %2305 = vmatprep.subr.bf16.mxu0 %v3695_v37  ;;  %v3785_v36 = vld [vmem:[%s4863_s2 + $0x784] ss:$8 sps:$4 sm:$0xff]   ;;  %v3780_v37 = vld [vmem:[%s4863_s2 + $0x680] ss:$8 sps:$4 sm:$0xff]  }
 0x171   : > { %1636 = vmatmul.mubr.bf16.vlgmr.msra.gmra.mxu1 %v4140_v33 }
 0x172   : > { %1870 = vmatmul.mubr.bf16.vlgmr.msra.gmra.mxu0 %v4140_v33  ;;  %2072 = vmatpush1.bf16.msra.mxu1 %v3690_v38  ;;  %v3783_v38 = vld [vmem:[%s4863_s2 + $0x780] ss:$8 sps:$4 sm:$0xff]  }
 0x173   : > { %2103 = vmatprep.mubr.bf16.mxu1 %v4132_v30  ;;  %2306 = vmatpush1.bf16.msra.mxu0 %v3693_v39  ;;  %v3788_v39 = vld [vmem:[%s4863_s2 + $0x874] ss:$8 sps:$4 sm:$0xff]  }
 0x174   : > { %2337 = vmatprep.mubr.bf16.mxu0 %v4132_v30  ;;  %2073 = vmatprep.subr.bf16.mxu1 %v3698_v40  ;;  %v3786_v40 = vld [vmem:[%s4863_s2 + $0x870] ss:$8 sps:$4 sm:$0xff]  }
 0x175   : > { %2307 = vmatprep.subr.bf16.mxu0 %v3701_v41  ;;  %v3791_v41 = vld [vmem:[%s4863_s2 + $0x864] ss:$8 sps:$4 sm:$0xff]  }
 0x176   : > { %2074 = vmatpush1.bf16.msra.mxu1 %v3696_v42 }
 0x177   : > { %2308 = vmatpush1.bf16.msra.mxu0 %v3699_v43  ;;  %2075 = vmatprep.subr.bf16.mxu1 %v3704_v44 }
 0x178   : > { %2309 = vmatprep.subr.bf16.mxu0 %v3707_v45  ;;  %v3789_v45 = vld [vmem:[%s4863_s2 + $0x860] ss:$8 sps:$4 sm:$0xff]  }
 0x17a   : > { %2076 = vmatpush1.bf16.msra.mxu1 %v3702_v46 }
 0x17b   : > { %2310 = vmatpush1.bf16.msra.mxu0 %v3705_v47  ;;  %2077 = vmatprep.subr.bf16.mxu1 %v3710_v48  ;;  %v3794_v48 = vld [vmem:[%s4863_s2 + $0x854] ss:$8 sps:$4 sm:$0xff]  }
 0x17c   : > { %2311 = vmatprep.subr.bf16.mxu0 %v3713_v49 }
 0x17e   : > { %2078 = vmatpush1.bf16.msra.mxu1 %v3708_v50 }
 0x17f   : > { %2312 = vmatpush1.bf16.msra.mxu0 %v3711_v51  ;;  %2079 = vmatprep.subr.bf16.mxu1 %v3716_v52 }
 0x180   : > { %2313 = vmatprep.subr.bf16.mxu0 %v3719_v53 }
 0x182   : > { %2080 = vmatpush1.bf16.msra.mxu1 %v3714_v54  ;;  %v3797_v54 = vld [vmem:[%s4863_s2 + $0x844] ss:$8 sps:$4 sm:$0xff]  }
 0x183   : > { %2314 = vmatpush1.bf16.msra.mxu0 %v3717_v55  ;;  %2081 = vmatprep.subr.bf16.mxu1 %v3722_v56  ;;  %v3795_v55 = vld [vmem:[%s4863_s2 + $0x840] ss:$8 sps:$4 sm:$0xff]   ;;  %v3798_v56 = vld [vmem:[%s4863_s2 + $0x830] ss:$8 sps:$4 sm:$0xff]  }
 0x184   : > { %2315 = vmatprep.subr.bf16.mxu0 %v3725_v57  ;;  %v3803_v57 = vld [vmem:[%s4863_s2 + $0x824] ss:$8 sps:$4 sm:$0xff]  }
 0x186   : > { %2082 = vmatpush1.bf16.msra.mxu1 %v3720_v58  ;;  %v3801_v58 = vld [vmem:[%s4863_s2 + $0x820] ss:$8 sps:$4 sm:$0xff]  }
 0x187   : > { %2316 = vmatpush1.bf16.msra.mxu0 %v3723_v59  ;;  %2083 = vmatprep.subr.bf16.mxu1 %v3728_v60  ;;  %v3806_v59 = vld [vmem:[%s4863_s2 + $0x814] ss:$8 sps:$4 sm:$0xff]   ;;  %v3804_v60 = vld [vmem:[%s4863_s2 + $0x810] ss:$8 sps:$4 sm:$0xff]  }
 0x188   : > { %2317 = vmatprep.subr.bf16.mxu0 %v3731_v61  ;;  %v3809_v61 = vld [vmem:[%s4863_s2 + $0x804] ss:$8 sps:$4 sm:$0xff]  }
 0x18a   : > { %2084 = vmatpush1.bf16.msra.mxu1 %v3726_v62  ;;  %v3807_v62 = vld [vmem:[%s4863_s2 + $0x800] ss:$8 sps:$4 sm:$0xff]  }
 0x18b   : > { %2318 = vmatpush1.bf16.msra.mxu0 %v3729_v63  ;;  %2085 = vmatprep.subr.bf16.mxu1 %v3734_v1  ;;  %v3812_v63 = vld [vmem:[%s4863_s2 + $0x8f4] ss:$8 sps:$4 sm:$0xff]   ;;  %v3810_v1 = vld [vmem:[%s4863_s2 + $0x8f0] ss:$8 sps:$4 sm:$0xff]  }
 0x18c   : > { %2319 = vmatprep.subr.bf16.mxu0 %v3737_v2  ;;  %v3815_v2 = vld [vmem:[%s4863_s2 + $0x8e4] ss:$8 sps:$4 sm:$0xff]  }
 0x18e   : > { %2086 = vmatpush1.bf16.msra.mxu1 %v3732_v3  ;;  %v3813_v3 = vld [vmem:[%s4863_s2 + $0x8e0] ss:$8 sps:$4 sm:$0xff]  }
 0x18f   : > { %2320 = vmatpush1.bf16.msra.mxu0 %v3735_v4  ;;  %2087 = vmatprep.subr.bf16.mxu1 %v3740_v5  ;;  %v3818_v4 = vld [vmem:[%s4863_s2 + $0x8d4] ss:$8 sps:$4 sm:$0xff]   ;;  %v3816_v5 = vld [vmem:[%s4863_s2 + $0x8d0] ss:$8 sps:$4 sm:$0xff]  }
 0x190   : > { %2321 = vmatprep.subr.bf16.mxu0 %v3743_v6  ;;  %v3821_v6 = vld [vmem:[%s4863_s2 + $0x8c4] ss:$8 sps:$4 sm:$0xff]  }
 0x192   : > { %2088 = vmatpush2.bf16.msra.mxu1 %v3738_v7  ;;  %v3819_v7 = vld [vmem:[%s4863_s2 + $0x8c0] ss:$8 sps:$4 sm:$0xff]  }
 0x193   : > { %2322 = vmatpush2.bf16.msra.mxu0 %v3741_v8  ;;  %2089 = vmatprep.subr.bf16.mxu1 %v3746_v9  ;;  %v3824_v8 = vld [vmem:[%s4863_s2 + $0x8b4] ss:$8 sps:$4 sm:$0xff]   ;;  %v3822_v9 = vld [vmem:[%s4863_s2 + $0x8b0] ss:$8 sps:$4 sm:$0xff]  }
 0x194   : > { %2323 = vmatprep.subr.bf16.mxu0 %v3749_v10  ;;  %v3827_v10 = vld [vmem:[%s4863_s2 + $0x8a4] ss:$8 sps:$4 sm:$0xff]  }
 0x196   : > { %2090 = vmatpush2.bf16.msra.mxu1 %v3744_v11  ;;  %v3825_v11 = vld [vmem:[%s4863_s2 + $0x8a0] ss:$8 sps:$4 sm:$0xff]  }
 0x197   : > { %2324 = vmatpush2.bf16.msra.mxu0 %v3747_v12  ;;  %2091 = vmatprep.subr.bf16.mxu1 %v3752_v13  ;;  %v3830_v12 = vld [vmem:[%s4863_s2 + $0x894] ss:$8 sps:$4 sm:$0xff]   ;;  %v3828_v13 = vld [vmem:[%s4863_s2 + $0x890] ss:$8 sps:$4 sm:$0xff]  }
 0x198   : > { %2325 = vmatprep.subr.bf16.mxu0 %v3755_v14  ;;  %v3833_v14 = vld [vmem:[%s4863_s2 + $0x884] ss:$8 sps:$4 sm:$0xff]  }
 0x19a   : > { %2092 = vmatpush2.bf16.msra.mxu1 %v3750_v15  ;;  %v3831_v15 = vld [vmem:[%s4863_s2 + $0x880] ss:$8 sps:$4 sm:$0xff]  }
 0x19b   : > { %2326 = vmatpush2.bf16.msra.mxu0 %v3753_v16  ;;  %2093 = vmatprep.subr.bf16.mxu1 %v3758_v17 }
 0x19c   : > { %2327 = vmatprep.subr.bf16.mxu0 %v3761_v18 }
 0x19e   : > { %2094 = vmatpush2.bf16.msra.mxu1 %v3756_v19 }
 0x19f   : > { %2328 = vmatpush2.bf16.msra.mxu0 %v3759_v20  ;;  %2095 = vmatprep.subr.bf16.mxu1 %v3764_v21 }
 0x1a0   : > { %2329 = vmatprep.subr.bf16.mxu0 %v3767_v22 }
 0x1a2   : > { %2096 = vmatpush2.bf16.msra.mxu1 %v3762_v23 }
 0x1a3   : > { %2330 = vmatpush2.bf16.msra.mxu0 %v3765_v24  ;;  %2097 = vmatprep.subr.bf16.mxu1 %v3770_v25 }
 0x1a4   : > { %2331 = vmatprep.subr.bf16.mxu0 %v3773_v26 }
 0x1a6   : > { %2098 = vmatpush2.bf16.msra.mxu1 %v3768_v27 }
 0x1a7   : > { %2332 = vmatpush2.bf16.msra.mxu0 %v3771_v28  ;;  %2099 = vmatprep.subr.bf16.mxu1 %v3776_v29 }
 0x1a8   : > { %2333 = vmatprep.subr.bf16.mxu0 %v3779_v31 }
 0x1aa   : > { %2100 = vmatpush2.bf16.msra.mxu1 %v3774_v32 }
 0x1ab   : > { %2334 = vmatpush2.bf16.msra.mxu0 %v3777_v34  ;;  %2101 = vmatprep.subr.bf16.mxu1 %v3782_v35 }
 0x1ac   : > { %2335 = vmatprep.subr.bf16.mxu0 %v3785_v36 }
 0x1ae   : > { %2102 = vmatpush2.bf16.msra.mxu1 %v3780_v37 }
 0x1af   : > { %2336 = vmatpush2.bf16.msra.mxu0 %v3783_v38  ;;  %2539 = vmatprep.subr.bf16.mxu1 %v3788_v39 }
 0x1b1   : > { %2104 = vmatmul.mubr.bf16.vlgmr.msra.gmra.mxu1 %v4140_v33  ;;  %v4730_v42 = vpop.f32.mrf.mxu1  ;;  %v4732_v43 = vpop.f32.mrf.mxu0 }
 0x1b2   : > { %2338 = vmatmul.mubr.bf16.vlgmr.msra.gmra.mxu0 %v4140_v33  ;;  %v2580_v44 = vpack.c.bf16 %v4732_v43, %v4730_v42  ;;  %2540 = vmatpush1.bf16.msra.mxu1 %v3786_v40 }
 0x1b3   : > { %2571 = vmatprep.mubr.bf16.mxu1 %v4132_v30  ;;  %v4741_v46 = vpop.f32.mrf.mxu1  ;;  %v4743_v47 = vpop.f32.mrf.mxu0  ;;  %2541 = vmatprep.subr.bf16.mxu1 %v3791_v41  ;;  %v3792_v30 = vld [vmem:[%s4863_s2 + $0x850] ss:$8 sps:$4 sm:$0xff]  }
 0x1b4   : > { %v2581_v49 = vpack.c.bf16 %v4743_v47, %v4741_v46  ;;  %2638 = vmatprep.mubr.bf16.mxu0 %v3842_v0  ;;  %v3800_v0 = vld [vmem:[%s4863_s2 + $0x834] ss:$8 sps:$4 sm:$0xff]   ;;  %v2649_v46 = vld [vmem:[%s4868_s7] sm:$0xff] }
 0x1b5   : > { %v705_v50 = vpop.f32.mrf.mxu1  ;;  %v939_v51 = vpop.f32.mrf.mxu0 }
 0x1b6   : > { %2542 = vmatpush1.bf16.msra.mxu1 %v3789_v45 }
 0x1b7   : > { %v706_v52 = vpop.f32.mrf.mxu1  ;;  %v940_v53 = vpop.f32.mrf.mxu0  ;;  %2543 = vmatprep.subr.bf16.mxu1 %v3794_v48 }
 0x1ba   : > { %2544 = vmatpush1.bf16.msra.mxu1 %v3792_v30 }
 0x1bb   : > { %2545 = vmatprep.subr.bf16.mxu1 %v3797_v54 }
 0x1be   : > { %2546 = vmatpush1.bf16.msra.mxu1 %v3795_v55 }
 0x1bf   : > { %2547 = vmatprep.subr.bf16.mxu1 %v3800_v0 }
 0x1c2   : > { %2548 = vmatpush1.bf16.msra.mxu1 %v3798_v56 }
 0x1c3   : > { %2549 = vmatprep.subr.bf16.mxu1 %v3803_v57 }
 0x1c6   : > { %2550 = vmatpush1.bf16.msra.mxu1 %v3801_v58 }
 0x1c7   : > { %2551 = vmatprep.subr.bf16.mxu1 %v3806_v59  ;;  %v2648_v59 = vld [vmem:[%s347_s13 + $0x8] sm:$0xff] }
 0x1ca   : > { %2552 = vmatpush1.bf16.msra.mxu1 %v3804_v60  ;;  %v2590_v60 = vld [vmem:[%s4866_s5] sm:$0xf] }
 0x1cb   : > { %2553 = vmatprep.subr.bf16.mxu1 %v3809_v61  ;;  %v2647_v61 = vld [vmem:[%s347_s13] sm:$0xff] }
 0x1ce   : > { %2554 = vmatpush1.bf16.msra.mxu1 %v3807_v62  ;;  %v3843_v62 = vmov 0.0  }
 0x1cf   : > { %2555 = vmatprep.subr.bf16.mxu1 %v3812_v63  ;;  %v2595_v63 = vpop.permute.xlu0 %2594 }
 0x1d2   : > { %2556 = vmatpush2.bf16.msra.mxu1 %v3810_v1 }
 0x1d3   : > { %2557 = vmatprep.subr.bf16.mxu1 %v3815_v2 }
 0x1d6   : > { %2558 = vmatpush2.bf16.msra.mxu1 %v3813_v3 }
 0x1d7   : > { %2559 = vmatprep.subr.bf16.mxu1 %v3818_v4 }
 0x1da   : > { %2560 = vmatpush2.bf16.msra.mxu1 %v3816_v5 }
 0x1db   : > { %2561 = vmatprep.subr.bf16.mxu1 %v3821_v6 }
 0x1de   : > { %2562 = vmatpush2.bf16.msra.mxu1 %v3819_v7 }
 0x1df   : > { %2563 = vmatprep.subr.bf16.mxu1 %v3824_v8 }
 0x1e2   : > { %2564 = vmatpush2.bf16.msra.mxu1 %v3822_v9 }
 0x1e3   : > { %2565 = vmatprep.subr.bf16.mxu1 %v3827_v10 }
 0x1e6   : > { %2566 = vmatpush2.bf16.msra.mxu1 %v3825_v11 }
 0x1e7   : > { %2567 = vmatprep.subr.bf16.mxu1 %v3830_v12 }
 0x1ea   : > { %2568 = vmatpush2.bf16.msra.mxu1 %v3828_v13 }
 0x1eb   : > { %2569 = vmatprep.subr.bf16.mxu1 %v3833_v14 }
 0x1ee   : > { %2570 = vmatpush2.bf16.msra.mxu1 %v3831_v15 }
 0x1f1   : > { %v1169_v16 = vpop.f32.mrf.mxu1  ;;  %v1403_v17 = vpop.f32.mrf.mxu0  ;;  %2572 = vmatmul.mubr.bf16.vlgmr.msra.gmra.mxu1 %v4140_v33  ;;  %v2650_v33 = vld [vmem:[%s4869_s8] sm:$0xff] }
 0x1f2   : > { %v2582_v18 = vpack.c.bf16 %v1403_v17, %v1169_v16  ;;  %2653 = vperm.xlu1 %3387, %v2650_v33  }
 0x1f3   : > { %v1171_v19 = vpop.f32.mrf.mxu1  ;;  %v1405_v20 = vpop.f32.mrf.mxu0 }
 0x1f4   : > { %v2583_v21 = vpack.c.bf16 %v1405_v20, %v1171_v19 }
 0x1f5   : > { %v1173_v22 = vpop.f32.mrf.mxu1  ;;  %v1407_v23 = vpop.f32.mrf.mxu0 }
 0x1f7   : > { %v1174_v24 = vpop.f32.mrf.mxu1  ;;  %v1408_v25 = vpop.f32.mrf.mxu0 }
 0x231   : > { %v1637_v26 = vpop.f32.mrf.mxu1 }
 0x232   : > { %v1871_v27 = vpop.f32.mrf.mxu0 }
 0x233   : > { %v2584_v28 = vpack.c.bf16 %v1871_v27, %v1637_v26  ;;  %v1639_v29 = vpop.f32.mrf.mxu1 }
 0x234   : > { %v1873_v31 = vpop.f32.mrf.mxu0 }
 0x235   : > { %v2585_v32 = vpack.c.bf16 %v1873_v31, %v1639_v29  ;;  %v1641_v34 = vpop.f32.mrf.mxu1 }
 0x236   : > { %v1875_v35 = vpop.f32.mrf.mxu0 }
 0x237   : > { %v1642_v36 = vpop.f32.mrf.mxu1 }
 0x238   : > { %v1876_v37 = vpop.f32.mrf.mxu0 }
 0x271   : > { %v2105_v38 = vpop.f32.mrf.mxu1 }
 0x272   : > { %v2339_v39 = vpop.f32.mrf.mxu0 }
 0x273   : > { %v2586_v40 = vpack.c.bf16 %v2339_v39, %v2105_v38  ;;  %v2107_v41 = vpop.f32.mrf.mxu1 }
 0x274   : > { %v2341_v45 = vpop.f32.mrf.mxu0 }
 0x275   : > { %v2587_v48 = vpack.c.bf16 %v2341_v45, %v2107_v41  ;;  %v2109_v50 = vpop.f32.mrf.mxu1 }
 0x276   : > { %v2343_v51 = vpop.f32.mrf.mxu0 }
 0x277   : > { %v2110_v30 = vpop.f32.mrf.mxu1 }
 0x278   : > { %v2344_v52 = vpop.f32.mrf.mxu0 }
 0x2b1   : > { %v2573_v53 = vpop.f32.mrf.mxu1 }
 0x2b2   : > { %v2588_v54 = vpack.c.bf16 %v2573_v53, %v2573_v53 }
 0x2b3   : > { %v2575_v55 = vpop.f32.mrf.mxu1 }
 0x2b4   : > { %v2589_v0 = vpack.c.bf16 %v2575_v55, %v2575_v55  ;;  %v2601_v57 = vsel %vm419_vm0, %v2588_v54, 0 }
 0x2b5   : > { %v2577_v56 = vpop.f32.mrf.mxu1 }
 0x2b6   : > { %3368 = vmatprep.subr.msk.bf16.mxu0 %vm419_vm0, %v2589_v0 }
 0x2b7   : > { %v2578_v58 = vpop.f32.mrf.mxu1  ;;  %2613 = vmatpush1.bf16.msra.mxu0 %v2601_v57 }
 0x2b8   : > { %2614 = vmatprep.subr.bf16.mxu0 %v2587_v48 }
 0x2bb   : > { %2615 = vmatpush1.bf16.msra.mxu0 %v2586_v40 }
 0x2bc   : > { %2616 = vmatprep.subr.bf16.mxu0 %v2585_v32 }
 0x2bf   : > { %2617 = vmatpush1.bf16.msra.mxu0 %v2584_v28 }
 0x2c0   : > { %2618 = vmatprep.subr.bf16.mxu0 %v2583_v21 }
 0x2c3   : > { %2619 = vmatpush1.bf16.msra.mxu0 %v2582_v18 }
 0x2c4   : > { %2620 = vmatprep.subr.bf16.mxu0 %v2581_v49  ;;  %v2654_v49 = vpop.permute.xlu1 %2653 }
 0x2c7   : > { %2621 = vmatpush1.bf16.msra.mxu0 %v2580_v44 }
 0x2c8   : > { %2690 = vmatprep.subr.mxu0 %v2648_v59 }
 0x2ca   : > { %3369 = vmatmul.mubr.msk.bf16.vlgmr.msra.gmra.mxu0 %vm415_vm1, %v2590_v60 }
 0x2cb   : > { %2691 = vmatpush1.msra.mxu0 %v2647_v61  ;;  %2724 = vmatprep.mubr.f32.mxu0 %v3843_v62 }
 0x2d2   : > { %3370 = vmatmul.mubr.msk.f32.vlgmr.msra.gmra.mxu0 %vm2656_vm4, %v2649_v46 }
 0x38a   : > { %v2640_v47 = vpop.f32.mrf.mxu0 }
 0x38b   : > { %v2641_v2 = vadd.f32 %v2640_v47, %v2595_v63 }
 0x38c   : > { %v2642_v42 = vpop.f32.mrf.mxu0 }
 0x38d   : > { %v2643_v5 = vadd.f32 %v2642_v42, %v2595_v63 }
 0x38e   : > { %v2644_v43 = vpop.f32.mrf.mxu0 }
 0x390   : > { %v2645_v44 = vpop.f32.mrf.mxu0 }
 0x392   : > { %v2726_v1 = vpop.f32.mrf.mxu0 }
 0x393   : > { %v2727_v3 = vadd.f32 %v2726_v1, %v2654_v49 }
 0x394   : > { %v2728_v4 = vpop.f32.mrf.mxu0 }
 0x395   : > { %v2731_v6 = vadd.f32 %v2727_v3, %v2641_v2  ;;  %v2729_v7 = vadd.f32 %v2728_v4, %v2654_v49 }
 0x397   : > { %2733 = vst [vmem:[%s352_s19] sm:$0xff] %v2731_v6  ;;  %v2732_v8 = vadd.f32 %v2729_v7, %v2643_v5 }
 0x399   : > { %2734 = vst [vmem:[%s352_s19 + $0x8] sm:$0xff] %v2732_v8 }
 0x39a PF: > { %s19_s30 = sadd.s32 1, %s3840_s30  }
 0x39b   : > { %p16_p4 = scmp.ge.s32.totalorder %s19_s30, 4  }
 0x39d   :  { %18 = sbr.rel (!%p16_p4) target bundleno = 1 (0x1), region = 97 }

</bundles_post_ra>
